<compile_context>
chip_gen: v7x
topology: tpu7x:2x2x1
jax: 0.10.0
libtpu: 0.0.40
codegen_flags: <defaults>
</compile_context>

<pallas_src>
import functools
import math

import jax
import jax.numpy as jnp
from jax import lax
from jax.experimental import pallas as pl
from jax.experimental.pallas import tpu as pltpu

BN_EPS = 1e-5


def _block_kernel(x_ref, w1_ref, w2_ref, g1_ref, b1_ref, g2_ref, b2_ref,
                  cmap_ref, out_ref, pad_ref, *, n, h, w, cp):
    """Fused ResNet Block.

    x_ref   : (N*(H+2), (W+2)*Cp) f32   zero-padded, channel-padded input rows
    w*_ref  : (3, (W+2)*Cp, W*Cp) bf16  block-Toeplitz row-conv matrices
    g*,b*   : (1, W*Cp) f32             BN gamma/beta tiled over the w lanes
    cmap_ref: (W*Cp, W*Cp) f32          channel fold+broadcast matrix (has 1/NHW)
    out_ref : (N*H, W*Cp) f32           lane-dense output rows
    pad_ref : (N*(H+2), (W+2)*Cp) f32   scratch: padded conv1 activations
    """
    hp = h + 2
    wl = w * cp            # lane width of valid rows (multiple of 128)
    wpl = (w + 2) * cp     # lane width of padded rows

    def row_conv(src_ref, w_ref):
        # 3 MXU matmuls per image: height-shifted row slab @ Toeplitz weights.
        per_image = []
        for n_i in range(n):
            acc = jnp.zeros((h, wl), jnp.float32)
            for kh in range(3):
                slab = src_ref[pl.ds(n_i * hp + kh, h), :].astype(jnp.bfloat16)
                acc += jnp.dot(slab, w_ref[kh],
                               preferred_element_type=jnp.float32)
            per_image.append(acc)
        return jnp.concatenate(per_image, axis=0)            # (N*H, WL) f32

    def batchnorm(y, g, b):
        # Training-mode BN in one pass: var = E[y^2] - mean^2 (biased).
        # cmap folds lanes of the same channel together, broadcasts the result
        # back to every lane of that channel, and divides by N*H*W.
        cmap = cmap_ref[...]
        mean = jnp.sum(jnp.dot(y, cmap, preferred_element_type=jnp.float32),
                       axis=0, keepdims=True)                # (1, WL)
        ex2 = jnp.sum(jnp.dot(y * y, cmap, preferred_element_type=jnp.float32),
                      axis=0, keepdims=True)
        var = ex2 - mean * mean
        return (y - mean) * lax.rsqrt(var + BN_EPS) * g + b

    # ---- conv1 reads the pre-padded input directly from x_ref ----
    y = row_conv(x_ref, w1_ref)
    y = jnp.maximum(batchnorm(y, g1_ref[...], b1_ref[...]), 0.0)   # BN1 + ReLU

    # ---- stage conv1 activations into the zero-haloed scratch for conv2 ----
    # Zero only the 1-pixel halo; the interior is fully overwritten below.
    zcol = jnp.zeros((n * hp, cp), jnp.float32)
    pad_ref[:, pl.ds(0, cp)] = zcol                    # left halo (+ chan pad)
    pad_ref[:, pl.ds(cp + wl, cp)] = zcol              # right halo
    zrow = jnp.zeros((1, wpl), jnp.float32)
    for n_i in range(n):
        pad_ref[pl.ds(n_i * hp, 1), :] = zrow          # top halo row
        pad_ref[pl.ds(n_i * hp + h + 1, 1), :] = zrow  # bottom halo row
        pad_ref[pl.ds(n_i * hp + 1, h), pl.ds(cp, wl)] = y[n_i * h:(n_i + 1) * h, :]

    # ---- conv2 + BN2 ----
    y = row_conv(pad_ref, w2_ref)
    y = batchnorm(y, g2_ref[...], b2_ref[...])

    # ---- residual add + ReLU (re-read x from VMEM instead of keeping it live)
    for n_i in range(n):
        res = x_ref[pl.ds(n_i * hp + 1, h), pl.ds(cp, wl)]
        out_ref[pl.ds(n_i * h, h), :] = jnp.maximum(
            y[n_i * h:(n_i + 1) * h, :] + res, 0.0)


def _pick_cp(c, w):
    """Smallest Cp >= C such that W*Cp is a multiple of 128 (lane-dense rows)."""
    step = 128 // math.gcd(w, 128)
    return ((c + step - 1) // step) * step


def _row_conv_weights(w_oihw, w, c, cp):
    """OIHW (C,C,3,3) -> (3, (W+2)*Cp, W*Cp) bf16 block-Toeplitz row matrices.

    M[kh][wi*Cp+ci, wo*Cp+co] = weight[kh, wi-wo, ci, co] for wi-wo in {0,1,2}.
    """
    w_hwio = jnp.transpose(w_oihw, (2, 3, 1, 0)).astype(jnp.float32)  # (3,3,Ci,Co)
    wpad = jnp.zeros((3, 3, cp, cp), jnp.float32).at[:, :, :c, :c].set(w_hwio)
    wp = w + 2
    wi = jnp.arange(wp)[:, None]                 # padded input column
    wo = jnp.arange(w)[None, :]                  # output column
    kw = wi - wo                                 # which of the 3 width taps
    valid = (kw >= 0) & (kw <= 2)
    g = wpad[:, jnp.clip(kw, 0, 2)]              # (3, Wp, W, Cp, Cp)
    g = jnp.where(valid[None, :, :, None, None], g, 0.0)
    big = jnp.transpose(g, (0, 1, 3, 2, 4)).reshape(3, wp * cp, w * cp)
    return big.astype(jnp.bfloat16)


def _lane_affine(v, c, cp, w):
    """Per-channel (C,) vector -> (1, W*Cp) lane vector matching (w, c) lanes."""
    vp = jnp.zeros((cp,), jnp.float32).at[:c].set(jnp.asarray(v, jnp.float32))
    return jnp.tile(vp, w).reshape(1, w * cp)


def resnet_block(x_nchw, w1_oihw, g1, b1, w2_oihw, g2, b2):
    """Forward pass of Block. x_nchw: (N, C, H, W) float32 -> (N, C, H, W)."""
    n, c, h, w = x_nchw.shape
    cp = _pick_cp(c, w)
    hp, wl, wpl = h + 2, w * cp, (w + 2) * cp

    # Layout plumbing (wrapper side): NCHW -> zero-padded, channel-padded,
    # lane-dense rows of shape (N*(H+2), (W+2)*Cp).
    x_nhwc = jnp.transpose(x_nchw, (0, 2, 3, 1)).astype(jnp.float32)
    xp = jnp.zeros((n, hp, w + 2, cp), jnp.float32)
    xp = xp.at[:, 1:h + 1, 1:w + 1, :c].set(x_nhwc)
    x2d = xp.reshape(n * hp, wpl)

    w1big = _row_conv_weights(w1_oihw, w, c, cp)
    w2big = _row_conv_weights(w2_oihw, w, c, cp)
    g1l, b1l = _lane_affine(g1, c, cp, w), _lane_affine(b1, c, cp, w)
    g2l, b2l = _lane_affine(g2, c, cp, w), _lane_affine(b2, c, cp, w)

    # Channel fold+broadcast matrix for BN stats over (w, c)-interleaved lanes.
    lane_c = jnp.arange(wl) % cp
    cmap = (lane_c[:, None] == lane_c[None, :]).astype(jnp.float32) / float(n * h * w)

    kernel = functools.partial(_block_kernel, n=n, h=h, w=w, cp=cp)
    vmem = pl.BlockSpec(memory_space=pltpu.MemorySpace.VMEM)

    conv_flops = 2 * n * 3 * (2 * h * wpl * wl)        # both convs (MXU matmuls)
    bytes_accessed = (4 * (x2d.size + n * h * wl + cmap.size)
                      + 2 * (w1big.size + w2big.size))
    cost = pl.CostEstimate(flops=conv_flops, transcendentals=2 * wl,
                           bytes_accessed=bytes_accessed)

    out2d = pl.pallas_call(
        kernel,
        out_shape=jax.ShapeDtypeStruct((n * h, wl), jnp.float32),
        in_specs=[vmem] * 8,
        out_specs=vmem,
        scratch_shapes=[pltpu.VMEM((n * hp, wpl), jnp.float32)],
        cost_estimate=cost,
        compiler_params=pltpu.CompilerParams(vmem_limit_bytes=32 * 1024 * 1024),
    )(x2d, w1big, w2big, g1l, b1l, g2l, b2l, cmap)

    return out2d.reshape(n, h, w, cp)[..., :c].transpose(0, 3, 1, 2)


def _reference(x_nchw, w1_oihw, g1, b1, w2_oihw, g2, b2):
    """Pure-JAX reference (matches PyTorch Block.forward in training mode)."""
    x = jnp.transpose(x_nchw, (0, 2, 3, 1))

    def conv(a, w_oihw):
        w_hwio = jnp.transpose(w_oihw, (2, 3, 1, 0))
        return lax.conv_general_dilated(a, w_hwio, (1, 1), "SAME",
                                        dimension_numbers=("NHWC", "HWIO", "NHWC"))

    def bn(a, g, b):
        mean = jnp.mean(a, axis=(0, 1, 2), keepdims=True)
        var = jnp.mean(jnp.square(a - mean), axis=(0, 1, 2), keepdims=True)
        return (a - mean) * lax.rsqrt(var + BN_EPS) * g + b

    h1 = jnp.maximum(bn(conv(x, w1_oihw), g1, b1), 0.0)
    h2 = bn(conv(h1, w2_oihw), g2, b2)
    out = jnp.maximum(h2 + x, 0.0)
    return jnp.transpose(out, (0, 3, 1, 2))


if __name__ == "__main__":
    N, C, H, W = 2, 4, 16, 16  # num_channels = 4

    key = jax.random.PRNGKey(0)
    k = jax.random.split(key, 7)
    x = jax.random.normal(k[0], (N, C, H, W), jnp.float32)
    # Deterministic synthetic parameters (PyTorch shapes: conv weight OIHW, bias-free).
    w1 = 0.2 * jax.random.normal(k[1], (C, C, 3, 3), jnp.float32)
    w2 = 0.2 * jax.random.normal(k[2], (C, C, 3, 3), jnp.float32)
    g1 = 1.0 + 0.1 * jax.random.normal(k[3], (C,), jnp.float32)
    b1 = 0.1 * jax.random.normal(k[4], (C,), jnp.float32)
    g2 = 1.0 + 0.1 * jax.random.normal(k[5], (C,), jnp.float32)
    b2 = 0.1 * jax.random.normal(k[6], (C,), jnp.float32)

    out = jax.block_until_ready(resnet_block(x, w1, g1, b1, w2, g2, b2))

    ref = _reference(x, w1, g1, b1, w2, g2, b2)
    assert out.shape == (N, C, H, W), out.shape
    # bf16 MXU inputs (f32 accumulation) vs. pure-f32 reference -> loosened
    # tolerance, as anticipated in the performance review.
    max_err = float(jnp.max(jnp.abs(out - ref)))
    assert jnp.allclose(out, ref, atol=5e-2, rtol=5e-2), max_err
    print("KERNEL_OK")
</pallas_src>

<mosaic_0001>
module attributes {stable_mosaic.version = 11 : i64} {
  func.func @_block_kernel(%arg0: memref<36x144xf32, #tpu.memory_space<vmem>>, %arg1: memref<3x144x128xbf16, #tpu.memory_space<vmem>>, %arg2: memref<3x144x128xbf16, #tpu.memory_space<vmem>>, %arg3: memref<1x128xf32, #tpu.memory_space<vmem>>, %arg4: memref<1x128xf32, #tpu.memory_space<vmem>>, %arg5: memref<1x128xf32, #tpu.memory_space<vmem>>, %arg6: memref<1x128xf32, #tpu.memory_space<vmem>>, %arg7: memref<128x128xf32, #tpu.memory_space<vmem>>, %arg8: memref<32x128xf32, #tpu.memory_space<vmem>>, %arg9: memref<36x144xf32, #tpu.memory_space<vmem>>) attributes {dimension_semantics = [], scalar_prefetch = 0 : i64, scratch_operands = 1 : i64, tpu.core_type = #tpu.core_type<tc>} {
    %cst = arith.constant 0.000000e+00 : f32
    %0 = vector.broadcast %cst : f32 to vector<16x128xf32>
    %c0 = arith.constant 0 : index
    %c0_0 = arith.constant 0 : index
    %1 = vector.load %arg0[%c0, %c0_0] : memref<36x144xf32, #tpu.memory_space<vmem>>, vector<16x144xf32>
    %2 = arith.truncf %1 : vector<16x144xf32> to vector<16x144xbf16>
    %c0_1 = arith.constant 0 : index
    %c0_2 = arith.constant 0 : index
    %c0_3 = arith.constant 0 : index
    %3 = vector.load %arg1[%c0_1, %c0_2, %c0_3] : memref<3x144x128xbf16, #tpu.memory_space<vmem>>, vector<1x144x128xbf16>
    %4 = vector.shape_cast %3 : vector<1x144x128xbf16> to vector<144x128xbf16>
    %cst_4 = arith.constant dense<0.000000e+00> : vector<16x128xf32>
    %5 = tpu.matmul %2, %4, %cst_4 {dimension_numbers = #tpu.dot_dimension_numbers<[1], [0], [0], [1], [0, 0, 1, 1], [], []>} : vector<16x144xbf16>, vector<144x128xbf16>, vector<16x128xf32> -> vector<16x128xf32>
    %6 = arith.addf %0, %5 : vector<16x128xf32>
    %c1 = arith.constant 1 : index
    %c0_5 = arith.constant 0 : index
    %7 = vector.load %arg0[%c1, %c0_5] : memref<36x144xf32, #tpu.memory_space<vmem>>, vector<16x144xf32>
    %8 = arith.truncf %7 : vector<16x144xf32> to vector<16x144xbf16>
    %c1_6 = arith.constant 1 : index
    %c0_7 = arith.constant 0 : index
    %c0_8 = arith.constant 0 : index
    %9 = vector.load %arg1[%c1_6, %c0_7, %c0_8] : memref<3x144x128xbf16, #tpu.memory_space<vmem>>, vector<1x144x128xbf16>
    %10 = vector.shape_cast %9 : vector<1x144x128xbf16> to vector<144x128xbf16>
    %cst_9 = arith.constant dense<0.000000e+00> : vector<16x128xf32>
    %11 = tpu.matmul %8, %10, %cst_9 {dimension_numbers = #tpu.dot_dimension_numbers<[1], [0], [0], [1], [0, 0, 1, 1], [], []>} : vector<16x144xbf16>, vector<144x128xbf16>, vector<16x128xf32> -> vector<16x128xf32>
    %12 = arith.addf %6, %11 : vector<16x128xf32>
    %c2 = arith.constant 2 : index
    %c0_10 = arith.constant 0 : index
    %13 = vector.load %arg0[%c2, %c0_10] : memref<36x144xf32, #tpu.memory_space<vmem>>, vector<16x144xf32>
    %14 = arith.truncf %13 : vector<16x144xf32> to vector<16x144xbf16>
    %c2_11 = arith.constant 2 : index
    %c0_12 = arith.constant 0 : index
    %c0_13 = arith.constant 0 : index
    %15 = vector.load %arg1[%c2_11, %c0_12, %c0_13] : memref<3x144x128xbf16, #tpu.memory_space<vmem>>, vector<1x144x128xbf16>
    %16 = vector.shape_cast %15 : vector<1x144x128xbf16> to vector<144x128xbf16>
    %cst_14 = arith.constant dense<0.000000e+00> : vector<16x128xf32>
    %17 = tpu.matmul %14, %16, %cst_14 {dimension_numbers = #tpu.dot_dimension_numbers<[1], [0], [0], [1], [0, 0, 1, 1], [], []>} : vector<16x144xbf16>, vector<144x128xbf16>, vector<16x128xf32> -> vector<16x128xf32>
    %18 = arith.addf %12, %17 : vector<16x128xf32>
    %cst_15 = arith.constant 0.000000e+00 : f32
    %19 = vector.broadcast %cst_15 : f32 to vector<16x128xf32>
    %c18 = arith.constant 18 : index
    %c0_16 = arith.constant 0 : index
    %20 = vector.load %arg0[%c18, %c0_16] : memref<36x144xf32, #tpu.memory_space<vmem>>, vector<16x144xf32>
    %21 = arith.truncf %20 : vector<16x144xf32> to vector<16x144xbf16>
    %c0_17 = arith.constant 0 : index
    %c0_18 = arith.constant 0 : index
    %c0_19 = arith.constant 0 : index
    %22 = vector.load %arg1[%c0_17, %c0_18, %c0_19] : memref<3x144x128xbf16, #tpu.memory_space<vmem>>, vector<1x144x128xbf16>
    %23 = vector.shape_cast %22 : vector<1x144x128xbf16> to vector<144x128xbf16>
    %cst_20 = arith.constant dense<0.000000e+00> : vector<16x128xf32>
    %24 = tpu.matmul %21, %23, %cst_20 {dimension_numbers = #tpu.dot_dimension_numbers<[1], [0], [0], [1], [0, 0, 1, 1], [], []>} : vector<16x144xbf16>, vector<144x128xbf16>, vector<16x128xf32> -> vector<16x128xf32>
    %25 = arith.addf %19, %24 : vector<16x128xf32>
    %c19 = arith.constant 19 : index
    %c0_21 = arith.constant 0 : index
    %26 = vector.load %arg0[%c19, %c0_21] : memref<36x144xf32, #tpu.memory_space<vmem>>, vector<16x144xf32>
    %27 = arith.truncf %26 : vector<16x144xf32> to vector<16x144xbf16>
    %c1_22 = arith.constant 1 : index
    %c0_23 = arith.constant 0 : index
    %c0_24 = arith.constant 0 : index
    %28 = vector.load %arg1[%c1_22, %c0_23, %c0_24] : memref<3x144x128xbf16, #tpu.memory_space<vmem>>, vector<1x144x128xbf16>
    %29 = vector.shape_cast %28 : vector<1x144x128xbf16> to vector<144x128xbf16>
    %cst_25 = arith.constant dense<0.000000e+00> : vector<16x128xf32>
    %30 = tpu.matmul %27, %29, %cst_25 {dimension_numbers = #tpu.dot_dimension_numbers<[1], [0], [0], [1], [0, 0, 1, 1], [], []>} : vector<16x144xbf16>, vector<144x128xbf16>, vector<16x128xf32> -> vector<16x128xf32>
    %31 = arith.addf %25, %30 : vector<16x128xf32>
    %c20 = arith.constant 20 : index
    %c0_26 = arith.constant 0 : index
    %32 = vector.load %arg0[%c20, %c0_26] : memref<36x144xf32, #tpu.memory_space<vmem>>, vector<16x144xf32>
    %33 = arith.truncf %32 : vector<16x144xf32> to vector<16x144xbf16>
    %c2_27 = arith.constant 2 : index
    %c0_28 = arith.constant 0 : index
    %c0_29 = arith.constant 0 : index
    %34 = vector.load %arg1[%c2_27, %c0_28, %c0_29] : memref<3x144x128xbf16, #tpu.memory_space<vmem>>, vector<1x144x128xbf16>
    %35 = vector.shape_cast %34 : vector<1x144x128xbf16> to vector<144x128xbf16>
    %cst_30 = arith.constant dense<0.000000e+00> : vector<16x128xf32>
    %36 = tpu.matmul %33, %35, %cst_30 {dimension_numbers = #tpu.dot_dimension_numbers<[1], [0], [0], [1], [0, 0, 1, 1], [], []>} : vector<16x144xbf16>, vector<144x128xbf16>, vector<16x128xf32> -> vector<16x128xf32>
    %37 = arith.addf %31, %36 : vector<16x128xf32>
    %38 = tpu.concatenate %18, %37 in 0 : vector<16x128xf32>, vector<16x128xf32> -> vector<32x128xf32>
    %c0_31 = arith.constant 0 : index
    %c0_32 = arith.constant 0 : index
    %39 = vector.load %arg3[%c0_31, %c0_32] : memref<1x128xf32, #tpu.memory_space<vmem>>, vector<1x128xf32>
    %c0_33 = arith.constant 0 : index
    %c0_34 = arith.constant 0 : index
    %40 = vector.load %arg4[%c0_33, %c0_34] : memref<1x128xf32, #tpu.memory_space<vmem>>, vector<1x128xf32>
    %c0_35 = arith.constant 0 : index
    %c0_36 = arith.constant 0 : index
    %41 = vector.load %arg7[%c0_35, %c0_36] : memref<128x128xf32, #tpu.memory_space<vmem>>, vector<128x128xf32>
    %cst_37 = arith.constant dense<0.000000e+00> : vector<32x128xf32>
    %42 = tpu.matmul %38, %41, %cst_37 {dimension_numbers = #tpu.dot_dimension_numbers<[1], [0], [0], [1], [0, 0, 1, 1], [], []>} : vector<32x128xf32>, vector<128x128xf32>, vector<32x128xf32> -> vector<32x128xf32>
    %cst_38 = arith.constant dense<0.000000e+00> : vector<128xf32>
    %43 = vector.multi_reduction <add>, %42, %cst_38 [0] : vector<32x128xf32> to vector<128xf32>
    %44 = vector.shape_cast %43 : vector<128xf32> to vector<1x128xf32>
    %45 = arith.mulf %38, %38 : vector<32x128xf32>
    %cst_39 = arith.constant dense<0.000000e+00> : vector<32x128xf32>
    %46 = tpu.matmul %45, %41, %cst_39 {dimension_numbers = #tpu.dot_dimension_numbers<[1], [0], [0], [1], [0, 0, 1, 1], [], []>} : vector<32x128xf32>, vector<128x128xf32>, vector<32x128xf32> -> vector<32x128xf32>
    %cst_40 = arith.constant dense<0.000000e+00> : vector<128xf32>
    %47 = vector.multi_reduction <add>, %46, %cst_40 [0] : vector<32x128xf32> to vector<128xf32>
    %48 = vector.shape_cast %47 : vector<128xf32> to vector<1x128xf32>
    %49 = arith.mulf %44, %44 : vector<1x128xf32>
    %50 = arith.subf %48, %49 : vector<1x128xf32>
    %51 = vector.broadcast %44 : vector<1x128xf32> to vector<32x128xf32>
    %52 = arith.subf %38, %51 : vector<32x128xf32>
    %cst_41 = arith.constant 9.99999974E-6 : f32
    %53 = vector.broadcast %cst_41 : f32 to vector<1x128xf32>
    %54 = arith.addf %50, %53 : vector<1x128xf32>
    %55 = math.rsqrt %54 : vector<1x128xf32>
    %56 = vector.broadcast %55 : vector<1x128xf32> to vector<32x128xf32>
    %57 = arith.mulf %52, %56 : vector<32x128xf32>
    %58 = vector.broadcast %39 : vector<1x128xf32> to vector<32x128xf32>
    %59 = arith.mulf %57, %58 : vector<32x128xf32>
    %60 = vector.broadcast %40 : vector<1x128xf32> to vector<32x128xf32>
    %61 = arith.addf %59, %60 : vector<32x128xf32>
    %cst_42 = arith.constant 0.000000e+00 : f32
    %62 = vector.broadcast %cst_42 : f32 to vector<32x128xf32>
    %63 = arith.maximumf %61, %62 : vector<32x128xf32>
    %cst_43 = arith.constant 0.000000e+00 : f32
    %64 = vector.broadcast %cst_43 : f32 to vector<36x8xf32>
    %c0_44 = arith.constant 0 : index
    %c0_45 = arith.constant 0 : index
    %65 = vector.load %arg9[%c0_44, %c0_45] : memref<36x144xf32, #tpu.memory_space<vmem>>, vector<36x8xf32>
    tpu.vector_store %arg9[%c0_44, %c0_45], %64 {strides = array<i32>} : memref<36x144xf32, #tpu.memory_space<vmem>>, vector<36x8xf32>,
    %c0_46 = arith.constant 0 : index
    %c136 = arith.constant 136 : index
    %66 = vector.load %arg9[%c0_46, %c136] : memref<36x144xf32, #tpu.memory_space<vmem>>, vector<36x8xf32>
    tpu.vector_store %arg9[%c0_46, %c136], %64 {strides = array<i32>} : memref<36x144xf32, #tpu.memory_space<vmem>>, vector<36x8xf32>,
    %cst_47 = arith.constant 0.000000e+00 : f32
    %67 = vector.broadcast %cst_47 : f32 to vector<1x144xf32>
    %c0_48 = arith.constant 0 : index
    %c0_49 = arith.constant 0 : index
    %68 = vector.load %arg9[%c0_48, %c0_49] : memref<36x144xf32, #tpu.memory_space<vmem>>, vector<1x144xf32>
    tpu.vector_store %arg9[%c0_48, %c0_49], %67 {strides = array<i32>} : memref<36x144xf32, #tpu.memory_space<vmem>>, vector<1x144xf32>,
    %c17 = arith.constant 17 : index
    %c0_50 = arith.constant 0 : index
    %69 = vector.load %arg9[%c17, %c0_50] : memref<36x144xf32, #tpu.memory_space<vmem>>, vector<1x144xf32>
    tpu.vector_store %arg9[%c17, %c0_50], %67 {strides = array<i32>} : memref<36x144xf32, #tpu.memory_space<vmem>>, vector<1x144xf32>,
    %70 = vector.extract_strided_slice %63 {offsets = [0, 0], sizes = [16, 128], strides = [1, 1]} : vector<32x128xf32> to vector<16x128xf32>
    %c1_51 = arith.constant 1 : index
    %c8 = arith.constant 8 : index
    %71 = vector.load %arg9[%c1_51, %c8] : memref<36x144xf32, #tpu.memory_space<vmem>>, vector<16x128xf32>
    tpu.vector_store %arg9[%c1_51, %c8], %70 {strides = array<i32>} : memref<36x144xf32, #tpu.memory_space<vmem>>, vector<16x128xf32>,
    %c18_52 = arith.constant 18 : index
    %c0_53 = arith.constant 0 : index
    %72 = vector.load %arg9[%c18_52, %c0_53] : memref<36x144xf32, #tpu.memory_space<vmem>>, vector<1x144xf32>
    tpu.vector_store %arg9[%c18_52, %c0_53], %67 {strides = array<i32>} : memref<36x144xf32, #tpu.memory_space<vmem>>, vector<1x144xf32>,
    %c35 = arith.constant 35 : index
    %c0_54 = arith.constant 0 : index
    %73 = vector.load %arg9[%c35, %c0_54] : memref<36x144xf32, #tpu.memory_space<vmem>>, vector<1x144xf32>
    tpu.vector_store %arg9[%c35, %c0_54], %67 {strides = array<i32>} : memref<36x144xf32, #tpu.memory_space<vmem>>, vector<1x144xf32>,
    %74 = vector.extract_strided_slice %63 {offsets = [16, 0], sizes = [16, 128], strides = [1, 1]} : vector<32x128xf32> to vector<16x128xf32>
    %c19_55 = arith.constant 19 : index
    %c8_56 = arith.constant 8 : index
    %75 = vector.load %arg9[%c19_55, %c8_56] : memref<36x144xf32, #tpu.memory_space<vmem>>, vector<16x128xf32>
    tpu.vector_store %arg9[%c19_55, %c8_56], %74 {strides = array<i32>} : memref<36x144xf32, #tpu.memory_space<vmem>>, vector<16x128xf32>,
    %cst_57 = arith.constant 0.000000e+00 : f32
    %76 = vector.broadcast %cst_57 : f32 to vector<16x128xf32>
    %c0_58 = arith.constant 0 : index
    %c0_59 = arith.constant 0 : index
    %77 = vector.load %arg9[%c0_58, %c0_59] : memref<36x144xf32, #tpu.memory_space<vmem>>, vector<16x144xf32>
    %78 = arith.truncf %77 : vector<16x144xf32> to vector<16x144xbf16>
    %c0_60 = arith.constant 0 : index
    %c0_61 = arith.constant 0 : index
    %c0_62 = arith.constant 0 : index
    %79 = vector.load %arg2[%c0_60, %c0_61, %c0_62] : memref<3x144x128xbf16, #tpu.memory_space<vmem>>, vector<1x144x128xbf16>
    %80 = vector.shape_cast %79 : vector<1x144x128xbf16> to vector<144x128xbf16>
    %cst_63 = arith.constant dense<0.000000e+00> : vector<16x128xf32>
    %81 = tpu.matmul %78, %80, %cst_63 {dimension_numbers = #tpu.dot_dimension_numbers<[1], [0], [0], [1], [0, 0, 1, 1], [], []>} : vector<16x144xbf16>, vector<144x128xbf16>, vector<16x128xf32> -> vector<16x128xf32>
    %82 = arith.addf %76, %81 : vector<16x128xf32>
    %c1_64 = arith.constant 1 : index
    %c0_65 = arith.constant 0 : index
    %83 = vector.load %arg9[%c1_64, %c0_65] : memref<36x144xf32, #tpu.memory_space<vmem>>, vector<16x144xf32>
    %84 = arith.truncf %83 : vector<16x144xf32> to vector<16x144xbf16>
    %c1_66 = arith.constant 1 : index
    %c0_67 = arith.constant 0 : index
    %c0_68 = arith.constant 0 : index
    %85 = vector.load %arg2[%c1_66, %c0_67, %c0_68] : memref<3x144x128xbf16, #tpu.memory_space<vmem>>, vector<1x144x128xbf16>
    %86 = vector.shape_cast %85 : vector<1x144x128xbf16> to vector<144x128xbf16>
    %cst_69 = arith.constant dense<0.000000e+00> : vector<16x128xf32>
    %87 = tpu.matmul %84, %86, %cst_69 {dimension_numbers = #tpu.dot_dimension_numbers<[1], [0], [0], [1], [0, 0, 1, 1], [], []>} : vector<16x144xbf16>, vector<144x128xbf16>, vector<16x128xf32> -> vector<16x128xf32>
    %88 = arith.addf %82, %87 : vector<16x128xf32>
    %c2_70 = arith.constant 2 : index
    %c0_71 = arith.constant 0 : index
    %89 = vector.load %arg9[%c2_70, %c0_71] : memref<36x144xf32, #tpu.memory_space<vmem>>, vector<16x144xf32>
    %90 = arith.truncf %89 : vector<16x144xf32> to vector<16x144xbf16>
    %c2_72 = arith.constant 2 : index
    %c0_73 = arith.constant 0 : index
    %c0_74 = arith.constant 0 : index
    %91 = vector.load %arg2[%c2_72, %c0_73, %c0_74] : memref<3x144x128xbf16, #tpu.memory_space<vmem>>, vector<1x144x128xbf16>
    %92 = vector.shape_cast %91 : vector<1x144x128xbf16> to vector<144x128xbf16>
    %cst_75 = arith.constant dense<0.000000e+00> : vector<16x128xf32>
    %93 = tpu.matmul %90, %92, %cst_75 {dimension_numbers = #tpu.dot_dimension_numbers<[1], [0], [0], [1], [0, 0, 1, 1], [], []>} : vector<16x144xbf16>, vector<144x128xbf16>, vector<16x128xf32> -> vector<16x128xf32>
    %94 = arith.addf %88, %93 : vector<16x128xf32>
    %cst_76 = arith.constant 0.000000e+00 : f32
    %95 = vector.broadcast %cst_76 : f32 to vector<16x128xf32>
    %c18_77 = arith.constant 18 : index
    %c0_78 = arith.constant 0 : index
    %96 = vector.load %arg9[%c18_77, %c0_78] : memref<36x144xf32, #tpu.memory_space<vmem>>, vector<16x144xf32>
    %97 = arith.truncf %96 : vector<16x144xf32> to vector<16x144xbf16>
    %c0_79 = arith.constant 0 : index
    %c0_80 = arith.constant 0 : index
    %c0_81 = arith.constant 0 : index
    %98 = vector.load %arg2[%c0_79, %c0_80, %c0_81] : memref<3x144x128xbf16, #tpu.memory_space<vmem>>, vector<1x144x128xbf16>
    %99 = vector.shape_cast %98 : vector<1x144x128xbf16> to vector<144x128xbf16>
    %cst_82 = arith.constant dense<0.000000e+00> : vector<16x128xf32>
    %100 = tpu.matmul %97, %99, %cst_82 {dimension_numbers = #tpu.dot_dimension_numbers<[1], [0], [0], [1], [0, 0, 1, 1], [], []>} : vector<16x144xbf16>, vector<144x128xbf16>, vector<16x128xf32> -> vector<16x128xf32>
    %101 = arith.addf %95, %100 : vector<16x128xf32>
    %c19_83 = arith.constant 19 : index
    %c0_84 = arith.constant 0 : index
    %102 = vector.load %arg9[%c19_83, %c0_84] : memref<36x144xf32, #tpu.memory_space<vmem>>, vector<16x144xf32>
    %103 = arith.truncf %102 : vector<16x144xf32> to vector<16x144xbf16>
    %c1_85 = arith.constant 1 : index
    %c0_86 = arith.constant 0 : index
    %c0_87 = arith.constant 0 : index
    %104 = vector.load %arg2[%c1_85, %c0_86, %c0_87] : memref<3x144x128xbf16, #tpu.memory_space<vmem>>, vector<1x144x128xbf16>
    %105 = vector.shape_cast %104 : vector<1x144x128xbf16> to vector<144x128xbf16>
    %cst_88 = arith.constant dense<0.000000e+00> : vector<16x128xf32>
    %106 = tpu.matmul %103, %105, %cst_88 {dimension_numbers = #tpu.dot_dimension_numbers<[1], [0], [0], [1], [0, 0, 1, 1], [], []>} : vector<16x144xbf16>, vector<144x128xbf16>, vector<16x128xf32> -> vector<16x128xf32>
    %107 = arith.addf %101, %106 : vector<16x128xf32>
    %c20_89 = arith.constant 20 : index
    %c0_90 = arith.constant 0 : index
    %108 = vector.load %arg9[%c20_89, %c0_90] : memref<36x144xf32, #tpu.memory_space<vmem>>, vector<16x144xf32>
    %109 = arith.truncf %108 : vector<16x144xf32> to vector<16x144xbf16>
    %c2_91 = arith.constant 2 : index
    %c0_92 = arith.constant 0 : index
    %c0_93 = arith.constant 0 : index
    %110 = vector.load %arg2[%c2_91, %c0_92, %c0_93] : memref<3x144x128xbf16, #tpu.memory_space<vmem>>, vector<1x144x128xbf16>
    %111 = vector.shape_cast %110 : vector<1x144x128xbf16> to vector<144x128xbf16>
    %cst_94 = arith.constant dense<0.000000e+00> : vector<16x128xf32>
    %112 = tpu.matmul %109, %111, %cst_94 {dimension_numbers = #tpu.dot_dimension_numbers<[1], [0], [0], [1], [0, 0, 1, 1], [], []>} : vector<16x144xbf16>, vector<144x128xbf16>, vector<16x128xf32> -> vector<16x128xf32>
    %113 = arith.addf %107, %112 : vector<16x128xf32>
    %114 = tpu.concatenate %94, %113 in 0 : vector<16x128xf32>, vector<16x128xf32> -> vector<32x128xf32>
    %c0_95 = arith.constant 0 : index
    %c0_96 = arith.constant 0 : index
    %115 = vector.load %arg5[%c0_95, %c0_96] : memref<1x128xf32, #tpu.memory_space<vmem>>, vector<1x128xf32>
    %c0_97 = arith.constant 0 : index
    %c0_98 = arith.constant 0 : index
    %116 = vector.load %arg6[%c0_97, %c0_98] : memref<1x128xf32, #tpu.memory_space<vmem>>, vector<1x128xf32>
    %c0_99 = arith.constant 0 : index
    %c0_100 = arith.constant 0 : index
    %117 = vector.load %arg7[%c0_99, %c0_100] : memref<128x128xf32, #tpu.memory_space<vmem>>, vector<128x128xf32>
    %cst_101 = arith.constant dense<0.000000e+00> : vector<32x128xf32>
    %118 = tpu.matmul %114, %117, %cst_101 {dimension_numbers = #tpu.dot_dimension_numbers<[1], [0], [0], [1], [0, 0, 1, 1], [], []>} : vector<32x128xf32>, vector<128x128xf32>, vector<32x128xf32> -> vector<32x128xf32>
    %cst_102 = arith.constant dense<0.000000e+00> : vector<128xf32>
    %119 = vector.multi_reduction <add>, %118, %cst_102 [0] : vector<32x128xf32> to vector<128xf32>
    %120 = vector.shape_cast %119 : vector<128xf32> to vector<1x128xf32>
    %121 = arith.mulf %114, %114 : vector<32x128xf32>
    %cst_103 = arith.constant dense<0.000000e+00> : vector<32x128xf32>
    %122 = tpu.matmul %121, %117, %cst_103 {dimension_numbers = #tpu.dot_dimension_numbers<[1], [0], [0], [1], [0, 0, 1, 1], [], []>} : vector<32x128xf32>, vector<128x128xf32>, vector<32x128xf32> -> vector<32x128xf32>
    %cst_104 = arith.constant dense<0.000000e+00> : vector<128xf32>
    %123 = vector.multi_reduction <add>, %122, %cst_104 [0] : vector<32x128xf32> to vector<128xf32>
    %124 = vector.shape_cast %123 : vector<128xf32> to vector<1x128xf32>
    %125 = arith.mulf %120, %120 : vector<1x128xf32>
    %126 = arith.subf %124, %125 : vector<1x128xf32>
    %127 = vector.broadcast %120 : vector<1x128xf32> to vector<32x128xf32>
    %128 = arith.subf %114, %127 : vector<32x128xf32>
    %cst_105 = arith.constant 9.99999974E-6 : f32
    %129 = vector.broadcast %cst_105 : f32 to vector<1x128xf32>
    %130 = arith.addf %126, %129 : vector<1x128xf32>
    %131 = math.rsqrt %130 : vector<1x128xf32>
    %132 = vector.broadcast %131 : vector<1x128xf32> to vector<32x128xf32>
    %133 = arith.mulf %128, %132 : vector<32x128xf32>
    %134 = vector.broadcast %115 : vector<1x128xf32> to vector<32x128xf32>
    %135 = arith.mulf %133, %134 : vector<32x128xf32>
    %136 = vector.broadcast %116 : vector<1x128xf32> to vector<32x128xf32>
    %137 = arith.addf %135, %136 : vector<32x128xf32>
    %c1_106 = arith.constant 1 : index
    %c8_107 = arith.constant 8 : index
    %138 = vector.load %arg0[%c1_106, %c8_107] : memref<36x144xf32, #tpu.memory_space<vmem>>, vector<16x128xf32>
    %139 = vector.extract_strided_slice %137 {offsets = [0, 0], sizes = [16, 128], strides = [1, 1]} : vector<32x128xf32> to vector<16x128xf32>
    %140 = arith.addf %139, %138 : vector<16x128xf32>
    %cst_108 = arith.constant 0.000000e+00 : f32
    %141 = vector.broadcast %cst_108 : f32 to vector<16x128xf32>
    %142 = arith.maximumf %140, %141 : vector<16x128xf32>
    %c0_109 = arith.constant 0 : index
    %c0_110 = arith.constant 0 : index
    %143 = vector.load %arg8[%c0_109, %c0_110] : memref<32x128xf32, #tpu.memory_space<vmem>>, vector<16x128xf32>
    tpu.vector_store %arg8[%c0_109, %c0_110], %142 {strides = array<i32>} : memref<32x128xf32, #tpu.memory_space<vmem>>, vector<16x128xf32>,
    %c19_111 = arith.constant 19 : index
    %c8_112 = arith.constant 8 : index
    %144 = vector.load %arg0[%c19_111, %c8_112] : memref<36x144xf32, #tpu.memory_space<vmem>>, vector<16x128xf32>
    %145 = vector.extract_strided_slice %137 {offsets = [16, 0], sizes = [16, 128], strides = [1, 1]} : vector<32x128xf32> to vector<16x128xf32>
    %146 = arith.addf %145, %144 : vector<16x128xf32>
    %cst_113 = arith.constant 0.000000e+00 : f32
    %147 = vector.broadcast %cst_113 : f32 to vector<16x128xf32>
    %148 = arith.maximumf %146, %147 : vector<16x128xf32>
    %c16 = arith.constant 16 : index
    %c0_114 = arith.constant 0 : index
    %149 = vector.load %arg8[%c16, %c0_114] : memref<32x128xf32, #tpu.memory_space<vmem>>, vector<16x128xf32>
    tpu.vector_store %arg8[%c16, %c0_114], %148 {strides = array<i32>} : memref<32x128xf32, #tpu.memory_space<vmem>>, vector<16x128xf32>,
    return
  }
}

</mosaic_0001>

<bundles_post_ra>
// kernel: tpu_custom_call.1
= control target key start
LH: loop header
LB: loop body
LE: loop exit
PB: predicated region body
PF: predicated region fallthrough
CT: control target
= control target key end

     0   :  { %13 = vsyncpa [#allocation4], 0  ;;  %s3149_s0 = inlined_call_operand.hbm [shape: f32[36,144], index: 0, kind: input, shape index: {}]   ;;  %s3150_s1 = inlined_call_operand.hbm [shape: bf16[3,144,128], index: 1, kind: input, shape index: {}]   ;;  %s3151_s2 = inlined_call_operand.hbm [shape: bf16[3,144,128], index: 2, kind: input, shape index: {}]   ;;  %s3152_s3 = inlined_call_operand.vmem [shape: f32[1,128], index: 3, kind: input, shape index: {}]   ;;  %s3153_s4 = inlined_call_operand.vmem [shape: f32[1,128], index: 4, kind: input, shape index: {}]   ;;  %s3154_s5 = inlined_call_operand.vmem [shape: f32[1,128], index: 5, kind: input, shape index: {}]   ;;  %s3155_s6 = inlined_call_operand.vmem [shape: f32[1,128], index: 6, kind: input, shape index: {}]   ;;  %s3156_s7 = inlined_call_operand.hbm [shape: f32[128,128], index: 7, kind: input, shape index: {}]   ;;  %s3157_s8 = inlined_call_operand.hbm [shape: f32[32,128], index: 8, kind: output, shape index: {}]  }
   0x1   :  { %14 = vsyncpa [#allocation7], 0 }
   0x2   :  { %15 = vsyncpa [#allocation10], 0 }
   0x3   :  { %16 = vsyncpa [#allocation5], 0  ;;  %s2667_s27 = smov [#allocation6]   ;;  %s2549_s9 = scalar_lea.hbm %s3150_s1, 3456 }
   0x4   :  { %s34_s28 = sshll.u32 %s2667_s27, 4  ;;  %p2550_p0 = scmp.ne.s32.totalorder %s3150_s1, %s2549_s9  ;;  %s35_s28 = int_to_ptr.vmem [resolvable:$true] %s34_s28 }
   0x5   :  { %p2553_p1 = scmp.lt.u32.totalorder %s2549_s9, %s3150_s1 }
   0x7   :  { %p2555_p2 = pnand %p2553_p1, %p2550_p0 }
   0x9   :  { %2558 = shalt.err (!%p2555_p2)
}
   0xa   :  { %s2559_s14 = scalar_lea.vmem %s35_s28, 3456  ;;  %p2564_p4 = scmp.lt.s32.totalorder %s35_s28, %s35_s28 }
   0xb   :  { %p2560_p3 = scmp.ne.s32.totalorder %s35_s28, %s2559_s14  ;;  %p2565_p5 = scmp.lt.s32.totalorder %s2559_s14, %s2559_s14 }
   0xd   :  { %p2566_p6 = por %p2565_p5, %p2564_p4 }
   0xf   :  { %p2567_p7 = pnand %p2566_p6, %p2560_p3 }
  0x11   :  { %2570 = shalt.err (!%p2567_p7)
}
  0x12   :  { %s2668_s15 = smov 64   ;;  %s2669_s16 = smov 4  }
  0x13   :  { %40 = dma.hbm_to_vmem [thread:$0]  %s3150_s1, 3456, %s35_s28, [#allocation7], %s2668_s15, %s2668_s15, %s2669_s16  }
  0x14   :  { %s2670_s19 = smov [#allocation3]   ;;  %s2571_s23 = scalar_lea.hbm %s3149_s0, 1280 }
  0x15   :  { %s22_s20 = sshll.u32 %s2670_s19, 4  ;;  %p2572_p8 = scmp.ne.s32.totalorder %s3149_s0, %s2571_s23  ;;  %s23_s20 = int_to_ptr.vmem [resolvable:$true] %s22_s20 }
  0x16   :  { %p2575_p9 = scmp.lt.u32.totalorder %s2571_s23, %s3149_s0 }
  0x18   :  { %p2577_p10 = pnand %p2575_p9, %p2572_p8 }
  0x1a   :  { %2580 = shalt.err (!%p2577_p10)
}
  0x1b   :  { %s2581_s29 = scalar_lea.vmem %s23_s20, 1280  ;;  %p2586_p12 = scmp.lt.s32.totalorder %s23_s20, %s23_s20 }
  0x1c   :  { %p2582_p11 = scmp.ne.s32.totalorder %s23_s20, %s2581_s29  ;;  %p2587_p13 = scmp.lt.s32.totalorder %s2581_s29, %s2581_s29 }
  0x1e   :  { %p2588_p0 = por %p2587_p13, %p2586_p12 }
  0x20   :  { %p2589_p1 = pnand %p2588_p0, %p2582_p11 }
  0x22   :  { %2592 = shalt.err (!%p2589_p1)
}
  0x23   :  { %s2671_s1 = smov 256   ;;  %s2672_s28 = smov 16  }
  0x24   :  { %28 = dma.hbm_to_vmem [thread:$0]  %s3149_s0, 1280, %s23_s20, [#allocation4], %s2671_s1, %s2671_s1, %s2672_s28  }
  0x25   :  { %s2673_s10 = smov [#allocation8]   ;;  %s2674_s12 = smov [#allocation9]  }
  0x26   :  { %s46_s11 = sshll.u32 %s2673_s10, 4  ;;  %s66_s13 = sshll.u32 %s2674_s12, 4  ;;  %s47_s11 = int_to_ptr.vmem [resolvable:$true] %s46_s11  ;;  %s2753_s13 = int_to_ptr.vmem [resolvable:$true] %s66_s13 }
  0x27   :  { %s2593_s18 = scalar_lea.hbm %s3151_s2, 3456 }
  0x28   :  { %p2594_p2 = scmp.ne.s32.totalorder %s3151_s2, %s2593_s18  ;;  %p2597_p3 = scmp.lt.u32.totalorder %s2593_s18, %s3151_s2 }
  0x2a   :  { %p2599_p4 = pnand %p2597_p3, %p2594_p2 }
  0x2c   :  { %2602 = shalt.err (!%p2599_p4)
}
  0x2d   :  { %s2603_s0 = scalar_lea.vmem %s47_s11, 3456  ;;  %p2608_p6 = scmp.lt.s32.totalorder %s47_s11, %s47_s11 }
  0x2e   :  { %p2604_p5 = scmp.ne.s32.totalorder %s47_s11, %s2603_s0  ;;  %p2609_p7 = scmp.lt.s32.totalorder %s2603_s0, %s2603_s0 }
  0x30   :  { %p2610_p8 = por %p2609_p7, %p2608_p6 }
  0x32   :  { %p2611_p9 = pnand %p2610_p8, %p2604_p5 }
  0x34   :  { %2614 = shalt.err (!%p2611_p9)
}
  0x35   :  { %52 = dma.hbm_to_vmem [thread:$0]  %s3151_s2, 3456, %s47_s11, [#allocation7], %s2668_s15, %s2668_s15, %s2669_s16  }
  0x36   :  { %s2615_s27 = scalar_lea.hbm %s3156_s7, 2048 }
  0x37   :  { %p2616_p10 = scmp.ne.s32.totalorder %s3156_s7, %s2615_s27  ;;  %p2619_p11 = scmp.lt.u32.totalorder %s2615_s27, %s3156_s7 }
  0x39   :  { %p2621_p12 = pnand %p2619_p11, %p2616_p10 }
  0x3b   :  { %2624 = shalt.err (!%p2621_p12)
}
  0x3c   :  { %s2625_s9 = scalar_lea.vmem %s2753_s13, 2048  ;;  %p2630_p0 = scmp.lt.s32.totalorder %s2753_s13, %s2753_s13 }
  0x3d   :  { %p2626_p13 = scmp.ne.s32.totalorder %s2753_s13, %s2625_s9  ;;  %p2631_p1 = scmp.lt.s32.totalorder %s2625_s9, %s2625_s9 }
  0x3f   :  { %p2632_p2 = por %p2631_p1, %p2630_p0 }
  0x41   :  { %p2633_p3 = pnand %p2632_p2, %p2626_p13 }
  0x43   :  { %2636 = shalt.err (!%p2633_p3)
}
  0x44   :  { %s2675_s2 = smov 128   ;;  %s2676_s15 = smov 8  }
  0x45   :  { %72 = dma.hbm_to_vmem [thread:$0]  %s3156_s7, 2048, %s2753_s13, [#allocation10], %s2675_s2, %s2675_s2, %s2676_s15  }
  0x46   :  { %2659 = dma.done.wait [#allocation4], 1280  }
  0x47   :  { %2660 = vsyncadd [#allocation4], 4294966016 }
  0x48   :  { %2661 = dma.done.wait [#allocation7], 6912  }
  0x49   :  { %2662 = vsyncadd [#allocation7], 4294960384 }
  0x4a   :  { %2663 = dma.done.wait [#allocation10], 2048  }
  0x4b   :  { %2664 = vsyncadd [#allocation10], 4294965248  ;;  %v2677_v0 = vmov 0   ;;  %v2491_v1 = vld [vmem:[#allocation6 + $0x48] sm:$0xff]   ;;  %v2492_v2 = vld [vmem:[#allocation6 + $0x50] sm:$0xff]   ;;  %vm217_vm1 = vcmask 130048  }
  0x4c   :  { %221 = vmatprep.subr.bf16.mxu0 %v2677_v0  ;;  %556 = vmatprep.subr.bf16.mxu1 %v2677_v0  ;;  %v2493_v3 = vld [vmem:[#allocation6 + $0x58] sm:$0xff]   ;;  %v2494_v4 = vld [vmem:[#allocation6 + $0x60] sm:$0xff]   ;;  %v2796_v5 = vld [vmem:[#allocation3 + $0x18] sm:$0xff]  ;;  %vm137_vm0 = vsmask.f32 7424  ;;  %vm391_vm3 = vcmask 1046528  }
  0x4d   :  { %222 = vmatpush1.bf16.msra.mxu0 %v2491_v1  ;;  %557 = vmatpush1.bf16.msra.mxu1 %v2491_v1  ;;  %v111_v6 = vld [vmem:[#allocation3 + $0x8] sm:$0xfe]  ;;  %v113_v7 = vld [vmem:[#allocation3 + $0x28] sm:$0x1]  ;;  %v2799_v10 = vld [vmem:[#allocation3 + $0x38] sm:$0xff]  ;;  %vm664_vm4 = vcmask 1045504  }
  0x4e   :  { %223 = vmatprep.subr.bf16.mxu0 %v2677_v0  ;;  %558 = vmatprep.subr.bf16.mxu1 %v2677_v0  ;;  %v115_v8 = vpack.c.bf16 %v2796_v5, %v111_v6  ;;  %v117_v9 = vpack.c.bf16 %v113_v7, %v113_v7  ;;  %v510_v11 = vld [vmem:[#allocation3 + $0x28] sm:$0xf8]  ;;  %v512_v12 = vld [vmem:[#allocation3 + $0x48] sm:$0x7]  ;;  %v110_v15 = vld [vmem:[#allocation3] sm:$0xfe] }
  0x4f   :  { %v514_v13 = vpack.c.bf16 %v2799_v10, %v510_v11  ;;  %v516_v14 = vpack.c.bf16 %v512_v12, %v512_v12  ;;  %v2804_v19 = vld [vmem:[#allocation3 + $0x10] sm:$0xff]  ;;  %v2495_v24 = vld [vmem:[#allocation6 + $0x68] sm:$0xff]   ;;  %v509_v28 = vld [vmem:[#allocation3 + $0x20] sm:$0xf8]  ;;  %vm517_vm2 = vsmask.f32 6400 }
  0x50   :  { %v151_v16 = vshrl.u32 %v115_v8, 16  ;;  %v153_v17 = vshll.u32 %v115_v8, 16  ;;  %v158_v18 = vshll.u32 %v117_v9, 16  ;;  %v2806_v27 = vld [vmem:[#allocation3 + $0x30] sm:$0xff]  ;;  %v511_v33 = vld [vmem:[#allocation3 + $0x40] sm:$0x7]  ;;  %v114_v35 = vpack.c.bf16 %v2804_v19, %v110_v15 }
  0x51   :  { %224 = vmatpush1.bf16.msra.mxu0 %v2492_v2  ;;  %559 = vmatpush1.bf16.msra.mxu1 %v2492_v2  ;;  %v536_v20 = vshrl.u32 %v514_v13, 16  ;;  %v539_v21 = vshll.u32 %v514_v13, 16  ;;  %v544_v22 = vshrl.u32 %v516_v14, 16  ;;  %v547_v23 = vshll.u32 %v516_v14, 16  ;;  %v112_v38 = vld [vmem:[#allocation3 + $0x20] sm:$0x1] }
  0x52   :  { %225 = vmatprep.subr.bf16.mxu0 %v2677_v0  ;;  %560 = vmatprep.subr.bf16.mxu1 %v2677_v0  ;;  %v155_v25 = vrot.slane %v153_v17, 1  ;;  %v160_v26 = vrot.slane %v158_v18, 1  ;;  %v513_v39 = vpack.c.bf16 %v2806_v27, %v509_v28  ;;  %v515_v40 = vpack.c.bf16 %v511_v33, %v511_v33  ;;  %v2496_v41 = vld [vmem:[#allocation6 + $0x70] sm:$0xff]   ;;  %v2497_v44 = vld [vmem:[#allocation6 + $0x78] sm:$0xff]   ;;  %v2498_v54 = vld [vmem:[#allocation6 + $0x80] sm:$0xff]  }
  0x53   :  { %v538_v29 = vrot.slane %v536_v20, 1  ;;  %v541_v30 = vrot.slane %v539_v21, 2  ;;  %v546_v31 = vrot.slane %v544_v22, 1  ;;  %v549_v32 = vrot.slane %v547_v23, 2  ;;  %v500_v59 = vld [vmem:[#allocation3 + $0x28] sm:$0xfc] }
  0x54   :  { %v156_v34 = vor.u32 %v155_v25, %v151_v16  ;;  %v116_v45 = vpack.c.bf16 %v112_v38, %v112_v38  ;;  %v141_v46 = vshll.u32 %v114_v35, 16  ;;  %v519_v47 = vshrl.u32 %v513_v39, 16  ;;  %v504_v60 = vld [vmem:[#allocation3 + $0x48] sm:$0x3]  ;;  %v2499_v63 = vld [vmem:[#allocation6 + $0x88] sm:$0xff]   ;;  %v2500_v11 = vld [vmem:[#allocation6] sm:$0xff]  }
  0x55   :  { %226 = vmatpush1.bf16.msra.mxu0 %v2493_v3  ;;  %561 = vmatpush1.bf16.msra.mxu1 %v2493_v3  ;;  %v542_v36 = vor.u32 %v541_v30, %v538_v29  ;;  %v550_v37 = vor.u32 %v549_v32, %v546_v31  ;;  %v522_v48 = vshll.u32 %v513_v39, 16  ;;  %v527_v49 = vshrl.u32 %v515_v40, 16  ;;  %v87_v6 = vld [vmem:[#allocation3 + $0x8] sm:$0xff]  ;;  %v2501_v15 = vld [vmem:[#allocation6 + $0x8] sm:$0xff]   ;;  %v2502_v16 = vld [vmem:[#allocation6 + $0x10] sm:$0xff]  }
  0x56   :  { %227 = vmatprep.subr.bf16.mxu0 %v2677_v0  ;;  %562 = vmatprep.subr.bf16.mxu1 %v2677_v0  ;;  %v161_v42 = vsel %vm137_vm0, %v156_v34, %v160_v26  ;;  %v530_v50 = vshll.u32 %v515_v40, 16  ;;  %v139_v51 = vshrl.u32 %v114_v35, 16  ;;  %v143_v52 = vrot.slane %v141_v46, 1  ;;  %v2503_v17 = vld [vmem:[#allocation6 + $0x18] sm:$0xff]   ;;  %v2504_v18 = vld [vmem:[#allocation6 + $0x20] sm:$0xff]   ;;  %v2505_v20 = vld [vmem:[#allocation6 + $0x28] sm:$0xff]  }
  0x57   :  { %v551_v43 = vsel %vm517_vm2, %v542_v36, %v550_v37  ;;  %2024 = vmatprep.mubr.msk.bf16.mxu0 %vm217_vm1, %v161_v42  ;;  %v146_v53 = vshll.u32 %v116_v45, 16  ;;  %v521_v55 = vrot.slane %v519_v47, 1  ;;  %v524_v56 = vrot.slane %v522_v48, 2  ;;  %v2506_v21 = vld [vmem:[#allocation6 + $0x30] sm:$0xff]   ;;  %v361_v25 = vld [vmem:[#allocation3 + $0x8] sm:$0xfc] }
  0x58   :  { %2045 = vmatprep.mubr.msk.bf16.mxu1 %vm217_vm1, %v551_v43  ;;  %v529_v57 = vrot.slane %v527_v49, 1  ;;  %v532_v58 = vrot.slane %v530_v50, 2  ;;  %v506_v61 = vpack.c.bf16 %v2799_v10, %v500_v59  ;;  %v508_v62 = vpack.c.bf16 %v504_v60, %v504_v60  ;;  %v499_v22 = vld [vmem:[#allocation3 + $0x20] sm:$0xfc]  ;;  %v503_v23 = vld [vmem:[#allocation3 + $0x40] sm:$0x3] }
  0x59   :  { %228 = vmatpush1.bf16.msra.mxu0 %v2494_v4  ;;  %563 = vmatpush1.bf16.msra.mxu1 %v2494_v4  ;;  %v144_v1 = vor.u32 %v143_v52, %v139_v51  ;;  %v148_v2 = vrot.slane %v146_v53, 1  ;;  %v525_v3 = vor.u32 %v524_v56, %v521_v55  ;;  %v91_v13 = vpack.c.bf16 %v2796_v5, %v87_v6  ;;  %v363_v26 = vld [vmem:[#allocation3 + $0x28] sm:$0x3]  ;;  %v653_v30 = vld [vmem:[#allocation3 + $0x28] sm:$0xf0]  ;;  %v86_v32 = vld [vmem:[#allocation3] sm:$0xff] }
  0x5a   :  { %229 = vmatprep.subr.bf16.mxu0 %v2677_v0  ;;  %564 = vmatprep.subr.bf16.mxu1 %v2677_v0  ;;  %v533_v4 = vor.u32 %v532_v58, %v529_v57  ;;  %v604_v7 = vrot.slane %v506_v61, 1  ;;  %v605_v8 = vrot.slane %v508_v62, 1  ;;  %v505_v28 = vpack.c.bf16 %v2806_v27, %v499_v22  ;;  %v655_v31 = vld [vmem:[#allocation3 + $0x48] sm:$0xf]  ;;  %v2508_v37 = vld [vmem:[#allocation6 + $0x40] sm:$0xff]   ;;  %v2512_v49 = vld [vmem:[#allocation6 + $0xa8] sm:$0xff]  }
  0x5b   :  { %v149_v9 = vsel %vm137_vm0, %v144_v1, %v148_v2  ;;  %v507_v29 = vpack.c.bf16 %v503_v23, %v503_v23  ;;  %v365_v33 = vpack.c.bf16 %v2796_v5, %v361_v25  ;;  %v367_v34 = vpack.c.bf16 %v363_v26, %v363_v26  ;;  %v2509_v5 = vld [vmem:[#allocation6 + $0x90] sm:$0xff]   ;;  %v2510_v47 = vld [vmem:[#allocation6 + $0x98] sm:$0xff]   ;;  %v2511_v48 = vld [vmem:[#allocation6 + $0xa0] sm:$0xff]  }
  0x5c   :  { %v534_v12 = vsel %vm517_vm2, %v525_v3, %v533_v4  ;;  %v606_v14 = vsel %vm391_vm3, %v604_v7, %v605_v8  ;;  %v657_v35 = vpack.c.bf16 %v2799_v10, %v653_v30  ;;  %v659_v36 = vpack.c.bf16 %v655_v31, %v655_v31  ;;  %v2513_v50 = vld [vmem:[#allocation6 + $0xb0] sm:$0xff]   ;;  %v2514_v51 = vld [vmem:[#allocation6 + $0xb8] sm:$0xff]   ;;  %v2515_v52 = vld [vmem:[#allocation6 + $0xc0] sm:$0xff]  }
  0x5d   :  { %230 = vmatpush1.bf16.msra.mxu0 %v2495_v24  ;;  %565 = vmatpush1.bf16.msra.mxu1 %v2495_v24  ;;  %v2507_v24 = vld [vmem:[#allocation6 + $0x38] sm:$0xff]   ;;  %v601_v38 = vrot.slane %v505_v28, 1  ;;  %v602_v39 = vrot.slane %v507_v29, 1  ;;  %v90_v40 = vpack.c.bf16 %v2804_v19, %v86_v32  ;;  %v396_v42 = vrot.slane %v367_v34, 1  ;;  %v360_v53 = vld [vmem:[#allocation3] sm:$0xfc] }
  0x5e   :  { %231 = vmatprep.subr.bf16.mxu0 %v2677_v0  ;;  %566 = vmatprep.subr.bf16.mxu1 %v2677_v0  ;;  %v668_v43 = vrot.slane %v657_v35, 2  ;;  %v652_v55 = vld [vmem:[#allocation3 + $0x20] sm:$0xf0]  ;;  %v654_v56 = vld [vmem:[#allocation3 + $0x40] sm:$0xf]  ;;  %v364_v57 = vpack.c.bf16 %v2804_v19, %v360_v53  ;;  %v2516_v58 = vld [vmem:[#allocation6 + $0xc8] sm:$0xff]  }
  0x5f   :  { %v603_v10 = vsel %vm391_vm3, %v601_v38, %v602_v39  ;;  %v656_v60 = vpack.c.bf16 %v2806_v27, %v652_v55  ;;  %v658_v61 = vpack.c.bf16 %v654_v56, %v654_v56  ;;  %v720_v62 = vld [vmem:[#allocation9] sm:$0xff]  ;;  %v722_v27 = vld [vmem:[#allocation9 + $0x10] sm:$0xff]  ;;  %v723_v7 = vld [vmem:[#allocation9 + $0x18] sm:$0xff]  ;;  %vm964_vm5 = vcmask 64512  }
  0x60   :  { %v2517_v1 = vld [vmem:[#allocation6 + $0xd0] sm:$0xff]   ;;  %v392_v2 = vrot.slane %v364_v57, 1  ;;  %v730_v22 = vld [vmem:[#allocation9 + $0x50] sm:$0xff]  ;;  %v731_v23 = vld [vmem:[#allocation9 + $0x58] sm:$0xff]  ;;  %vm971_vm6 = vcmask 130112   ;;  %vm969_vm8 = vcmask 60416  }
  0x61   :  { %232 = vmatpush1.bf16.msra.mxu0 %v2496_v41  ;;  %567 = vmatpush1.bf16.msra.mxu1 %v2496_v41  ;;  %v395_v41 = vrot.slane %v365_v33, 1  ;;  %v665_v4 = vrot.slane %v656_v60, 2  ;;  %v666_v19 = vrot.slane %v658_v61, 2  ;;  %v732_v25 = vld [vmem:[#allocation9 + $0x60] sm:$0xff]  ;;  %v733_v26 = vld [vmem:[#allocation9 + $0x68] sm:$0xff]  ;;  %v734_v29 = vld [vmem:[#allocation9 + $0x70] sm:$0xff] }
  0x62   :  { %233 = vmatprep.subr.bf16.mxu0 %v2677_v0  ;;  %568 = vmatprep.subr.bf16.mxu1 %v2677_v0  ;;  %v2914_v28 = vpack.c.bf16 %v733_v26, %v732_v25  ;;  %v735_v30 = vld [vmem:[#allocation9 + $0x78] sm:$0xff]  ;;  %v2522_v26 = vld [vmem:[#allocation8 + $0x68] sm:$0xff]   ;;  %vm976_vm9 = vcmask 126016   ;;  %vm989_vm10 = vcmask 1040384   ;;  %vm1021_vm11 = vcmask 1042432  }
  0x63   :  { %v397_v45 = vsel %vm391_vm3, %v395_v41, %v396_v42  ;;  %v2920_v31 = vpack.c.bf16 %v735_v30, %v734_v29  ;;  %v2048_v30 = vld [vmem:[%s3152_s3] ss:$0 sm:$0xff]  ;;  %vm1009_vm12 = vcmask 1040448   ;;  %vm1011_vm13 = vcmask 57344   ;;  %s2679_s3 = smov 120  }
  0x64   :  { %vm1002_vm14 = vcmask 1047617   ;;  %vm1004_vm15 = vcmask 64513  }
  0x65   :  { %234 = vmatpush1.bf16.msra.mxu0 %v2497_v44  ;;  %569 = vmatpush1.bf16.msra.mxu1 %v2497_v44  ;;  %v669_v44 = vrot.slane %v659_v36, 2 }
  0x66   :  { %235 = vmatprep.subr.bf16.mxu0 %v2677_v0  ;;  %570 = vmatprep.subr.bf16.mxu1 %v2677_v0 }
  0x67   :  { %v670_v46 = vsel %vm664_vm4, %v668_v43, %v669_v44  ;;  %v2518_v44 = vld [vmem:[#allocation8 + $0x48] sm:$0xff]  }
  0x69   :  { %236 = vmatpush1.bf16.msra.mxu0 %v2498_v54  ;;  %571 = vmatpush1.bf16.msra.mxu1 %v2498_v54  ;;  %v362_v54 = vld [vmem:[#allocation3 + $0x20] sm:$0x3] }
  0x6a   :  { %237 = vmatprep.subr.bf16.mxu0 %v2677_v0  ;;  %572 = vmatprep.subr.bf16.mxu1 %v2677_v0  ;;  %v366_v59 = vpack.c.bf16 %v362_v54, %v362_v54 }
  0x6c   :  { %v393_v3 = vrot.slane %v366_v59, 1 }
  0x6d   :  { %238 = vmatpush1.bf16.msra.mxu0 %v2499_v63  ;;  %573 = vmatpush1.bf16.msra.mxu1 %v2499_v63  ;;  %v721_v63 = vld [vmem:[#allocation9 + $0x8] sm:$0xff] }
  0x6e   :  { %319 = vmatprep.subr.bf16.mxu0 %v2677_v0  ;;  %611 = vmatprep.subr.bf16.mxu1 %v2677_v0  ;;  %v2878_v6 = vpack.c.bf16 %v721_v63, %v720_v62  ;;  %v394_v8 = vsel %vm391_vm3, %v392_v2, %v393_v3 }
  0x70   :  { %254 = vmatmul.mubr.bf16.vlgmr.msra.gmra.mrb[0].mxu0 %v149_v9  ;;  %589 = vmatmul.mubr.bf16.vlgmr.msra.gmra.mrb[0].mxu1 %v534_v12  ;;  %v667_v9 = vsel %vm664_vm4, %v665_v4, %v666_v19  ;;  %v724_v12 = vld [vmem:[#allocation9 + $0x20] sm:$0xff] }
  0x71   :  { %320 = vmatpush1.bf16.msra.mxu0 %v2500_v11  ;;  %612 = vmatpush1.bf16.msra.mxu1 %v2500_v11  ;;  %v2884_v11 = vpack.c.bf16 %v723_v7, %v722_v27 }
  0x72   :  { %321 = vmatprep.subr.bf16.mxu0 %v2677_v0  ;;  %613 = vmatprep.subr.bf16.mxu1 %v2677_v0 }
  0x73   :  { %2034 = vmatprep.mubr.msk.bf16.mxu0 %vm217_vm1, %v91_v13  ;;  %2046 = vmatprep.mubr.msk.bf16.mxu1 %vm217_vm1, %v606_v14  ;;  %v725_v13 = vld [vmem:[#allocation9 + $0x28] sm:$0xff] }
  0x74   :  { %v2890_v14 = vpack.c.bf16 %v725_v13, %v724_v12 }
  0x75   :  { %322 = vmatpush1.bf16.msra.mxu0 %v2501_v15  ;;  %614 = vmatpush1.bf16.msra.mxu1 %v2501_v15  ;;  %v726_v15 = vld [vmem:[#allocation9 + $0x30] sm:$0xff] }
  0x76   :  { %323 = vmatprep.subr.bf16.mxu0 %v2677_v0  ;;  %615 = vmatprep.subr.bf16.mxu1 %v2677_v0 }
  0x79   :  { %324 = vmatpush1.bf16.msra.mxu0 %v2502_v16  ;;  %616 = vmatpush1.bf16.msra.mxu1 %v2502_v16  ;;  %v727_v16 = vld [vmem:[#allocation9 + $0x38] sm:$0xff] }
  0x7a   :  { %325 = vmatprep.subr.bf16.mxu0 %v2677_v0  ;;  %617 = vmatprep.subr.bf16.mxu1 %v2677_v0 }
  0x7d   :  { %326 = vmatpush1.bf16.msra.mxu0 %v2503_v17  ;;  %618 = vmatpush1.bf16.msra.mxu1 %v2503_v17  ;;  %v2896_v17 = vpack.c.bf16 %v727_v16, %v726_v15 }
  0x7e   :  { %327 = vmatprep.subr.bf16.mxu0 %v2677_v0  ;;  %619 = vmatprep.subr.bf16.mxu1 %v2677_v0 }
  0x81   :  { %328 = vmatpush1.bf16.msra.mxu0 %v2504_v18  ;;  %620 = vmatpush1.bf16.msra.mxu1 %v2504_v18  ;;  %v728_v18 = vld [vmem:[#allocation9 + $0x40] sm:$0xff] }
  0x82   :  { %329 = vmatprep.subr.bf16.mxu0 %v2677_v0  ;;  %621 = vmatprep.subr.bf16.mxu1 %v2677_v0 }
  0x85   :  { %330 = vmatpush1.bf16.msra.mxu0 %v2505_v20  ;;  %622 = vmatpush1.bf16.msra.mxu1 %v2505_v20  ;;  %v729_v20 = vld [vmem:[#allocation9 + $0x48] sm:$0xff] }
  0x86   :  { %331 = vmatprep.subr.bf16.mxu0 %v2677_v0  ;;  %623 = vmatprep.subr.bf16.mxu1 %v2677_v0 }
  0x89   :  { %332 = vmatpush1.bf16.msra.mxu0 %v2506_v21  ;;  %624 = vmatpush1.bf16.msra.mxu1 %v2506_v21  ;;  %v2902_v21 = vpack.c.bf16 %v729_v20, %v728_v18 }
  0x8a   :  { %333 = vmatprep.subr.bf16.mxu0 %v2677_v0  ;;  %625 = vmatprep.subr.bf16.mxu1 %v2677_v0 }
  0x8d   :  { %334 = vmatpush1.bf16.msra.mxu0 %v2507_v24  ;;  %626 = vmatpush1.bf16.msra.mxu1 %v2507_v24  ;;  %v2908_v24 = vpack.c.bf16 %v731_v23, %v730_v22 }
  0x8e   :  { %335 = vmatprep.subr.bf16.mxu0 %v2677_v0  ;;  %627 = vmatprep.subr.bf16.mxu1 %v2677_v0 }
  0x91   :  { %336 = vmatpush1.bf16.msra.mxu0 %v2508_v37  ;;  %628 = vmatpush1.bf16.msra.mxu1 %v2508_v37 }
  0x92   :  { %456 = vmatprep.subr.bf16.mxu0 %v2677_v0  ;;  %675 = vmatprep.subr.bf16.mxu1 %v2677_v0 }
  0x94   :  { %352 = vmatmul.mubr.bf16.vlgmr.msra.gmra.mrb[0].mxu0 %v90_v40  ;;  %644 = vmatmul.mubr.bf16.vlgmr.msra.gmra.mrb[0].mxu1 %v603_v10  ;;  %v2678_v10 = vmov 0.0  }
  0x95   :  { %457 = vmatpush1.bf16.msra.mxu0 %v2509_v5  ;;  %676 = vmatpush1.bf16.msra.mxu1 %v2509_v5  ;;  %v978_v5 = vlaneseq  ;;  %967 = vst.msk [vmem:[#allocation2 + $0x20] sm:$0xff] %vm964_vm5, %v2678_v10  ;;  %965 = vst.msk [vmem:[#allocation2] sm:$0xff] %vm964_vm5, %v2678_v10 }
  0x96   :  { %458 = vmatprep.subr.bf16.mxu0 %v2677_v0  ;;  %677 = vmatprep.subr.bf16.mxu1 %v2677_v0  ;;  %974 = vst.msk [vmem:[#allocation2 + $0x28] sm:$0xff] %vm971_vm6, %v2678_v10  ;;  %972 = vst.msk [vmem:[#allocation2 + $0x8] sm:$0xff] %vm971_vm6, %v2678_v10 }
  0x97   :  { %2044 = vmatprep.mubr.msk.bf16.mxu0 %vm217_vm1, %v397_v45  ;;  %2047 = vmatprep.mubr.msk.bf16.mxu1 %vm217_vm1, %v670_v46  ;;  %966 = vst.msk [vmem:[#allocation2 + $0x10] sm:$0xff] %vm964_vm5, %v2678_v10  ;;  %968 = vst.msk [vmem:[#allocation2 + $0x30] sm:$0xff] %vm964_vm5, %v2678_v10  ;;  %v2519_v45 = vld [vmem:[#allocation8 + $0x50] sm:$0xff]   ;;  %vm2962_vm7 = vcmp.lt.s32.totalorder %v978_v5, 144 }
  0x98   :  { %973 = vst.msk [vmem:[#allocation2 + $0x18] sm:$0xff] %vm971_vm6, %v2678_v10  ;;  %975 = vst.msk [vmem:[#allocation2 + $0x38] sm:$0xff] %vm971_vm6, %v2678_v10  ;;  %vm1034_vm6 = vcmask 1047619  }
  0x99   :  { %459 = vmatpush1.bf16.msra.mxu0 %v2510_v47  ;;  %678 = vmatpush1.bf16.msra.mxu1 %v2510_v47  ;;  %985 = vst.msk [vmem:[#allocation2 + $0x21] ss:$8 sm:$0x3] %vm2962_vm7, %v2678_v10  ;;  %1014 = vst.msk [vmem:[#allocation2 + $0x22] ss:$8 sm:$0x3] %vm2962_vm7, %v2678_v10 }
  0x9a   :  { %460 = vmatprep.subr.bf16.mxu0 %v2677_v0  ;;  %679 = vmatprep.subr.bf16.mxu1 %v2677_v0  ;;  %982 = vst.msk [vmem:[#allocation2] ss:$8 sm:$0x3] %vm2962_vm7, %v2678_v10  ;;  %v2520_v47 = vld [vmem:[#allocation8 + $0x58] sm:$0xff]  }
  0x9b   :  { %970 = vst.msk [vmem:[#allocation2 + $0x40] sm:$0xf] %vm969_vm8, %v2678_v10  ;;  %vm1006_vm8 = vcmask 1047616  }
  0x9c   :  { %977 = vst.msk [vmem:[#allocation2 + $0x48] sm:$0xf] %vm976_vm9, %v2678_v10  ;;  %vm1040_vm9 = vcmask 1042496  }
  0x9d   :  { %461 = vmatpush1.bf16.msra.mxu0 %v2511_v48  ;;  %680 = vmatpush1.bf16.msra.mxu1 %v2511_v48  ;;  %v2521_v48 = vld [vmem:[#allocation8 + $0x60] sm:$0xff]   ;;  %1017 = vst.msk [vmem:[#allocation2 + $0x43] ss:$8 sm:$0x3] %vm2962_vm7, %v2678_v10  ;;  %vm1036_vm7 = vcmask 64515  }
  0x9e   :  { %462 = vmatprep.subr.bf16.mxu0 %v2677_v0  ;;  %681 = vmatprep.subr.bf16.mxu1 %v2677_v0 }
  0xa1   :  { %463 = vmatpush1.bf16.msra.mxu0 %v2512_v49  ;;  %682 = vmatpush1.bf16.msra.mxu1 %v2512_v49 }
  0xa2   :  { %464 = vmatprep.subr.bf16.mxu0 %v2677_v0  ;;  %683 = vmatprep.subr.bf16.mxu1 %v2677_v0 }
  0xa5   :  { %465 = vmatpush1.bf16.msra.mxu0 %v2513_v50  ;;  %684 = vmatpush1.bf16.msra.mxu1 %v2513_v50 }
  0xa6   :  { %466 = vmatprep.subr.bf16.mxu0 %v2677_v0  ;;  %685 = vmatprep.subr.bf16.mxu1 %v2677_v0 }
  0xa9   :  { %467 = vmatpush1.bf16.msra.mxu0 %v2514_v51  ;;  %686 = vmatpush1.bf16.msra.mxu1 %v2514_v51 }
  0xaa   :  { %468 = vmatprep.subr.bf16.mxu0 %v2677_v0  ;;  %687 = vmatprep.subr.bf16.mxu1 %v2677_v0 }
  0xad   :  { %469 = vmatpush1.bf16.msra.mxu0 %v2515_v52  ;;  %688 = vmatpush1.bf16.msra.mxu1 %v2515_v52 }
  0xae   :  { %470 = vmatprep.subr.bf16.mxu0 %v2677_v0  ;;  %689 = vmatprep.subr.bf16.mxu1 %v2677_v0 }
  0xb1   :  { %471 = vmatpush1.bf16.msra.mxu0 %v2516_v58  ;;  %690 = vmatpush1.bf16.msra.mxu1 %v2516_v58 }
  0xb2   :  { %472 = vmatprep.subr.bf16.mxu0 %v2677_v0  ;;  %691 = vmatprep.subr.bf16.mxu1 %v2677_v0 }
  0xb5   :  { %473 = vmatpush1.bf16.msra.mxu0 %v2517_v1  ;;  %692 = vmatpush1.bf16.msra.mxu1 %v2517_v1 }
  0xb6   :  { %2318 = vmatprep.subr.bf16.mxu0 %v2878_v6  ;;  %2350 = vmatprep.subr.bf16.mxu1 %v2878_v6 }
  0xb8   :  { %489 = vmatmul.mubr.bf16.vlgmr.msra.gmra.mrb[0].mxu0 %v394_v8  ;;  %708 = vmatmul.mubr.bf16.vlgmr.msra.gmra.mrb[0].mxu1 %v667_v9 }
  0xb9   :  { %2320 = vmatpush3.bf16.msra.mxu0 %v2878_v6  ;;  %2352 = vmatpush3.bf16.msra.mxu1 %v2878_v6 }
  0xba   :  { %2322 = vmatprep.subr.bf16.mxu0 %v2884_v11  ;;  %2354 = vmatprep.subr.bf16.mxu1 %v2884_v11 }
  0xbd   :  { %2324 = vmatpush3.bf16.msra.mxu0 %v2884_v11  ;;  %2356 = vmatpush3.bf16.msra.mxu1 %v2884_v11 }
  0xbe   :  { %2326 = vmatprep.subr.bf16.mxu0 %v2890_v14  ;;  %2358 = vmatprep.subr.bf16.mxu1 %v2890_v14 }
  0xc1   :  { %2328 = vmatpush3.bf16.msra.mxu0 %v2890_v14  ;;  %2360 = vmatpush3.bf16.msra.mxu1 %v2890_v14 }
  0xc2   :  { %2330 = vmatprep.subr.bf16.mxu0 %v2896_v17  ;;  %2362 = vmatprep.subr.bf16.mxu1 %v2896_v17 }
  0xc5   :  { %2332 = vmatpush3.bf16.msra.mxu0 %v2896_v17  ;;  %2364 = vmatpush3.bf16.msra.mxu1 %v2896_v17 }
  0xc6   :  { %2334 = vmatprep.subr.bf16.mxu0 %v2902_v21  ;;  %2366 = vmatprep.subr.bf16.mxu1 %v2902_v21 }
  0xc9   :  { %2336 = vmatpush3.bf16.msra.mxu0 %v2902_v21  ;;  %2368 = vmatpush3.bf16.msra.mxu1 %v2902_v21 }
  0xca   :  { %2338 = vmatprep.subr.bf16.mxu0 %v2908_v24  ;;  %2370 = vmatprep.subr.bf16.mxu1 %v2908_v24 }
  0xcd   :  { %2340 = vmatpush3.bf16.msra.mxu0 %v2908_v24  ;;  %2372 = vmatpush3.bf16.msra.mxu1 %v2908_v24 }
  0xce   :  { %2342 = vmatprep.subr.bf16.mxu0 %v2914_v28  ;;  %2374 = vmatprep.subr.bf16.mxu1 %v2914_v28 }
  0xd1   :  { %2344 = vmatpush3.bf16.msra.mxu0 %v2914_v28  ;;  %2376 = vmatpush3.bf16.msra.mxu1 %v2914_v28 }
  0xd2   :  { %2346 = vmatprep.subr.bf16.mxu0 %v2920_v31  ;;  %2378 = vmatprep.subr.bf16.mxu1 %v2920_v31 }
  0xd5   :  { %2348 = vmatpush3.bf16.msra.mxu0 %v2920_v31  ;;  %2380 = vmatpush3.bf16.msra.mxu1 %v2920_v31 }
  0xd6   :  { %1177 = vmatprep.subr.bf16.mxu0 %v2677_v0  ;;  %1510 = vmatprep.subr.bf16.mxu1 %v2677_v0 }
 0x18b   :  { %v2930_v32 = vpop.f32.mrb[0].mxu0  ;;  %v2932_v33 = vpop.f32.mrb[0].mxu1 }
 0x18c   :  { %v830_v34 = vmul.f32 %v2930_v32, %v2930_v32  ;;  %v492_v35 = vpop.f32.mrb[1].mxu0  ;;  %v711_v36 = vpop.f32.mrb[1].mxu1  ;;  %2197 = vmatprep.mubr.f32.mxu0 %v2930_v32  ;;  %v832_v42 = vmul.f32 %v2932_v33, %v2932_v33 }
 0x18d   :  { %v2937_v37 = vpop.f32.mrb[2].mxu0  ;;  %v2939_v38 = vpop.f32.mrb[2].mxu1 }
 0x18e   :  { %v831_v39 = vmul.f32 %v2937_v37, %v2937_v37  ;;  %v495_v40 = vpop.f32.mrb[3].mxu0  ;;  %v714_v41 = vpop.f32.mrb[3].mxu1  ;;  %2198 = vmatmul.mubr.f32.vlgmr.msra.gmra.mrb[4].mxu0 %v2937_v37  ;;  %2235 = vmatprep.mubr.f32.mxu1 %v830_v34  ;;  %v833_v43 = vmul.f32 %v2939_v38, %v2939_v38 }
 0x18f   :  { %2200 = vmatprep.mubr.f32.mxu0 %v2932_v33  ;;  %1178 = vmatpush1.bf16.msra.mxu0 %v2518_v44 }
 0x190   :  { %2236 = vmatmul.mubr.f32.vlgmr.msra.gmra.mrb[4].mxu1 %v831_v39  ;;  %1179 = vmatprep.subr.bf16.mxu0 %v2677_v0 }
 0x191   :  { %2238 = vmatprep.mubr.f32.mxu1 %v832_v42  ;;  %1511 = vmatpush1.bf16.msra.mxu1 %v2518_v44 }
 0x192   :  { %2201 = vmatmul.mubr.f32.gmra.mrb[6].mxu0 %v2939_v38  ;;  %1512 = vmatprep.subr.bf16.mxu1 %v2677_v0 }
 0x193   :  { %1180 = vmatpush1.bf16.msra.mxu0 %v2519_v45 }
 0x194   :  { %2239 = vmatmul.mubr.f32.gmra.mrb[6].mxu1 %v833_v43  ;;  %1181 = vmatprep.subr.bf16.mxu0 %v2677_v0 }
 0x195   :  { %1513 = vmatpush1.bf16.msra.mxu1 %v2519_v45  ;;  %v2524_v45 = vld [vmem:[#allocation8 + $0x78] sm:$0xff]  }
 0x196   :  { %1514 = vmatprep.subr.bf16.mxu1 %v2677_v0 }
 0x197   :  { %1182 = vmatpush1.bf16.msra.mxu0 %v2520_v47 }
 0x198   :  { %1183 = vmatprep.subr.bf16.mxu0 %v2677_v0 }
 0x199   :  { %1515 = vmatpush1.bf16.msra.mxu1 %v2520_v47 }
 0x19a   :  { %1516 = vmatprep.subr.bf16.mxu1 %v2677_v0 }
 0x19b   :  { %1184 = vmatpush1.bf16.msra.mxu0 %v2521_v48 }
 0x19c   :  { %1185 = vmatprep.subr.bf16.mxu0 %v2677_v0 }
 0x19d   :  { %1517 = vmatpush1.bf16.msra.mxu1 %v2521_v48 }
 0x19e   :  { %1518 = vmatprep.subr.bf16.mxu1 %v2677_v0 }
 0x19f   :  { %1186 = vmatpush1.bf16.msra.mxu0 %v2522_v26 }
 0x1a0   :  { %1187 = vmatprep.subr.bf16.mxu0 %v2677_v0 }
 0x1a1   :  { %1519 = vmatpush1.bf16.msra.mxu1 %v2522_v26 }
 0x1a2   :  { %1520 = vmatprep.subr.bf16.mxu1 %v2677_v0 }
 0x261   :  { %v2199_v49 = vpop.f32.mrb[4].mxu0 }
 0x262   :  { %v802_v50 = vpop.f32.mrb[5].mxu0 }
 0x263   :  { %v821_v51 = vadd.f32 %v2199_v49, %v802_v50  ;;  %v2237_v52 = vpop.f32.mrb[4].mxu1 }
 0x264   :  { %v900_v53 = vpop.f32.mrb[5].mxu1 }
 0x265   :  { %v919_v54 = vadd.f32 %v2237_v52, %v900_v53  ;;  %v2202_v55 = vpop.f32.mrb[6].mxu0 }
 0x266   :  { %v812_v56 = vpop.f32.mrb[7].mxu0 }
 0x267   :  { %v822_v57 = vadd.f32 %v821_v51, %v812_v56  ;;  %v2240_v58 = vpop.f32.mrb[6].mxu1  ;;  %v2525_v51 = vld [vmem:[#allocation8 + $0x80] sm:$0xff]   ;;  %v2526_v56 = vld [vmem:[#allocation8 + $0x88] sm:$0xff]  }
 0x268   :  { %v910_v59 = vpop.f32.mrb[7].mxu1 }
 0x269   :  { %v823_v60 = vadd.f32 %v2202_v55, %v822_v57  ;;  %v920_v61 = vadd.f32 %v919_v54, %v910_v59 }
 0x26b   :  { %v824_v62 = vrot.slane %v823_v60, 4  ;;  %v921_v63 = vadd.f32 %v2240_v58, %v920_v61 }
 0x26d   :  { %v825_v1 = vadd.f32 %v824_v62, %v823_v60  ;;  %v922_v2 = vrot.slane %v921_v63, 4 }
 0x26f   :  { %v826_v3 = vrot.slane %v825_v1, 2  ;;  %v923_v4 = vadd.f32 %v922_v2, %v921_v63 }
 0x271   :  { %v827_v19 = vadd.f32 %v826_v3, %v825_v1  ;;  %v924_v27 = vrot.slane %v923_v4, 2 }
 0x273   :  { %v828_v7 = vrot.slane %v827_v19, 1  ;;  %v925_v8 = vadd.f32 %v924_v27, %v923_v4 }
 0x275   :  { %v829_v9 = vadd.f32 %v828_v7, %v827_v19  ;;  %v926_v12 = vrot.slane %v925_v8, 1 }
 0x277   :  { %v927_v13 = vadd.f32 %v926_v12, %v925_v8  ;;  %v928_v15 = vmul.f32 %v829_v9, %v829_v9  ;;  %v931_v16 = vsub.f32 %v2937_v37, %v829_v9  ;;  %v930_v18 = vsub.f32 %v2930_v32, %v829_v9  ;;  %v2049_v32 = vld [vmem:[%s3153_s4] ss:$0 sm:$0xff] }
 0x278   :  { %v932_v20 = vsub.f32 %v2932_v33, %v829_v9  ;;  %v933_v22 = vsub.f32 %v2939_v38, %v829_v9  ;;  %v2523_v33 = vld [vmem:[#allocation8 + $0x70] sm:$0xff]  }
 0x279   :  { %v929_v23 = vsub.f32 %v927_v13, %v928_v15  ;;  %1188 = vmatpush1.bf16.msra.mxu0 %v2523_v33  ;;  %1521 = vmatpush1.bf16.msra.mxu1 %v2523_v33 }
 0x27a   :  { %1189 = vmatprep.subr.bf16.mxu0 %v2677_v0  ;;  %1522 = vmatprep.subr.bf16.mxu1 %v2677_v0 }
 0x27b   :  { %v934_v25 = vadd.f32 1e-05, %v929_v23 }
 0x27d   :  { %2545 = vrsqrt.f32 %v934_v25  ;;  %1190 = vmatpush1.bf16.msra.mxu0 %v2524_v45  ;;  %1523 = vmatpush1.bf16.msra.mxu1 %v2524_v45 }
 0x27e   :  { %1191 = vmatprep.subr.bf16.mxu0 %v2677_v0  ;;  %1524 = vmatprep.subr.bf16.mxu1 %v2677_v0 }
 0x281   :  { %1192 = vmatpush1.bf16.msra.mxu0 %v2525_v51  ;;  %1525 = vmatpush1.bf16.msra.mxu1 %v2525_v51 }
 0x282   :  { %1193 = vmatprep.subr.bf16.mxu0 %v2677_v0  ;;  %1526 = vmatprep.subr.bf16.mxu1 %v2677_v0 }
 0x285   :  { %1194 = vmatpush1.bf16.msra.mxu0 %v2526_v56  ;;  %1527 = vmatpush1.bf16.msra.mxu1 %v2526_v56 }
 0x286   :  { %1275 = vmatprep.subr.bf16.mxu0 %v2677_v0  ;;  %1565 = vmatprep.subr.bf16.mxu1 %v2677_v0 }
 0x287   :  { %v2546_v29 = vpop.eup %2545 }
 0x288   :  { %v937_v34 = vmul.f32 %v2546_v29, %v931_v16  ;;  %v936_v35 = vmul.f32 %v2546_v29, %v930_v18  ;;  %v938_v36 = vmul.f32 %v2546_v29, %v932_v20  ;;  %v939_v37 = vmul.f32 %v2546_v29, %v933_v22 }
 0x28a   :  { %v947_v38 = vmul.f32 %v2048_v30, %v937_v34  ;;  %v946_v39 = vmul.f32 %v2048_v30, %v936_v35  ;;  %v948_v40 = vmul.f32 %v2048_v30, %v938_v36  ;;  %v949_v41 = vmul.f32 %v2048_v30, %v939_v37 }
 0x28c   :  { %v957_v42 = vadd.f32 %v2049_v32, %v947_v38  ;;  %v956_v43 = vadd.f32 %v2049_v32, %v946_v39  ;;  %v958_v44 = vadd.f32 %v2049_v32, %v948_v40  ;;  %v959_v5 = vadd.f32 %v2049_v32, %v949_v41 }
 0x28e   :  { %v961_v47 = vmax.f32 %v957_v42, 0.0  ;;  %v960_v48 = vmax.f32 %v956_v43, 0.0  ;;  %v962_v49 = vmax.f32 %v958_v44, 0.0  ;;  %v963_v50 = vmax.f32 %v959_v5, 0.0 }
 0x290   :  { %v991_v10 = vrot.slane %v961_v47, 7  ;;  %v990_v46 = vrot.slane %v960_v48, 7  ;;  %v1022_v52 = vrot.slane %v962_v49, 5  ;;  %v1023_v53 = vrot.slane %v963_v50, 5  ;;  %v2527_v50 = vld [vmem:[#allocation8] sm:$0xff]  }
 0x292   :  { %997 = vrot.lane.b32.xlu1 %v991_v10, %s2676_s15  ;;  %993 = vrot.lane.b32.xlu0 %v990_v46, %s2676_s15  ;;  %v992_v54 = vsel %vm989_vm10, %v990_v46, %v991_v10  ;;  %v1024_v55 = vsel %vm1021_vm11, %v1022_v52, %v1023_v53  ;;  %vm1042_vm10 = vcmask 59392  }
 0x296   :  { %1025 = vrot.lane.b32.xlu1 %v1022_v52, %s2676_s15  ;;  %995 = vrot.lane.b32.xlu0 %v992_v54, %s2676_s15 }
 0x29a   :  { %1029 = vrot.lane.b32.xlu1 %v1023_v53, %s2676_s15  ;;  %1027 = vrot.lane.b32.xlu0 %v1024_v55, %s2676_s15 }
 0x304   :  { %v998_v57 = vpop.permute.xlu1 %997  ;;  %v994_v58 = vpop.permute.xlu0 %993 }
 0x305   :  { %1010 = vst.msk [vmem:[#allocation2 + $0x20] sm:$0x1] %vm1009_vm12, %v998_v57 }
 0x306   :  { %1012 = vst.msk [vmem:[#allocation2 + $0x28] sm:$0x1] %vm1011_vm13, %v998_v57 }
 0x307   :  { %1003 = vst.msk [vmem:[#allocation2] sm:$0xfe] %vm1002_vm14, %v994_v58 }
 0x308   :  { %1005 = vst.msk [vmem:[#allocation2 + $0x8] sm:$0xfe] %vm1004_vm15, %v994_v58  ;;  %v1026_v59 = vpop.permute.xlu1 %1025  ;;  %v996_v60 = vpop.permute.xlu0 %995 }
 0x309   :  { %1035 = vst.msk [vmem:[#allocation2 + $0x20] sm:$0xf8] %vm1034_vm6, %v1026_v59 }
 0x30a   :  { %1037 = vst.msk [vmem:[#allocation2 + $0x28] sm:$0xf8] %vm1036_vm7, %v1026_v59 }
 0x30b   :  { %1007 = vst.msk [vmem:[#allocation2 + $0x10] sm:$0xff] %vm1006_vm8, %v996_v60 }
 0x30c   :  { %1008 = vst.msk [vmem:[#allocation2 + $0x18] sm:$0xff] %vm964_vm5, %v996_v60  ;;  %v1030_v61 = vpop.permute.xlu1 %1029  ;;  %v1028_v62 = vpop.permute.xlu0 %1027  ;;  %v1070_v2 = vld [vmem:[#allocation2 + $0x20] sm:$0x1] }
 0x30d   :  { %v1071_v63 = vld [vmem:[#allocation2 + $0x28] sm:$0x1]  ;;  %1041 = vst.msk [vmem:[#allocation2 + $0x40] sm:$0x7] %vm1040_vm9, %v1030_v61  ;;  %v1074_v3 = vpack.c.bf16 %v1070_v2, %v1070_v2  ;;  %v2528_v2 = vld [vmem:[#allocation8 + $0x8] sm:$0xff]  }
 0x30e   :  { %1043 = vst.msk [vmem:[#allocation2 + $0x48] sm:$0x7] %vm1042_vm10, %v1030_v61  ;;  %v1075_v1 = vpack.c.bf16 %v1071_v63, %v1071_v63  ;;  %v1068_v8 = vld [vmem:[#allocation2] sm:$0xfe] }
 0x30f   :  { %1038 = vst.msk [vmem:[#allocation2 + $0x30] sm:$0xff] %vm1006_vm8, %v1028_v62  ;;  %v1069_v4 = vld [vmem:[#allocation2 + $0x8] sm:$0xfe]  ;;  %v1103_v9 = vshll.u32 %v1074_v3, 16 }
 0x310   :  { %1039 = vst.msk [vmem:[#allocation2 + $0x38] sm:$0xff] %vm964_vm5, %v1028_v62  ;;  %v1115_v19 = vshll.u32 %v1075_v1, 16  ;;  %v1045_v15 = vld [vmem:[#allocation2 + $0x8] sm:$0xff]  ;;  %v1464_v25 = vld [vmem:[#allocation2 + $0x20] sm:$0xf8] }
 0x311   :  { %v1465_v16 = vld [vmem:[#allocation2 + $0x28] sm:$0xf8]  ;;  %v1105_v23 = vrot.slane %v1103_v9, 1 }
 0x312   :  { %v3018_v7 = vld [vmem:[#allocation2 + $0x10] sm:$0xff]  ;;  %v1117_v20 = vrot.slane %v1115_v19, 1  ;;  %v1455_v26 = vld [vmem:[#allocation2 + $0x28] sm:$0xfc] }
 0x313   :  { %v3016_v27 = vld [vmem:[#allocation2 + $0x18] sm:$0xff]  ;;  %v1072_v13 = vpack.c.bf16 %v3018_v7, %v1068_v8 }
 0x314   :  { %v1073_v12 = vpack.c.bf16 %v3016_v27, %v1069_v4  ;;  %v1049_v34 = vpack.c.bf16 %v3016_v27, %v1045_v15  ;;  %v1466_v40 = vld [vmem:[#allocation2 + $0x40] sm:$0x7]  ;;  %v2529_v15 = vld [vmem:[#allocation8 + $0x10] sm:$0xff]  }
 0x315   :  { %v1098_v22 = vshll.u32 %v1072_v13, 16  ;;  %v1096_v30 = vshrl.u32 %v1072_v13, 16  ;;  %v1467_v36 = vld [vmem:[#allocation2 + $0x48] sm:$0x7]  ;;  %v1470_v43 = vpack.c.bf16 %v1466_v40, %v1466_v40 }
 0x316   :  { %v1110_v18 = vshll.u32 %v1073_v12, 16  ;;  %v1108_v29 = vshrl.u32 %v1073_v12, 16  ;;  %v3025_v37 = vld [vmem:[#allocation2 + $0x30] sm:$0xff]  ;;  %v1471_v39 = vpack.c.bf16 %v1467_v36, %v1467_v36  ;;  %v1459_v41 = vld [vmem:[#allocation2 + $0x48] sm:$0x3] }
 0x317   :  { %v3023_v35 = vld [vmem:[#allocation2 + $0x38] sm:$0xff]  ;;  %v1100_v33 = vrot.slane %v1098_v22, 1  ;;  %v1468_v42 = vpack.c.bf16 %v3025_v37, %v1464_v25  ;;  %v1463_v5 = vpack.c.bf16 %v1459_v41, %v1459_v41  ;;  %v1481_v62 = vshrl.u32 %v1470_v43, 16  ;;  %v2533_v25 = vld [vmem:[#allocation8 + $0x30] sm:$0xff]  }
 0x318   :  { %v1112_v32 = vrot.slane %v1110_v18, 1  ;;  %v1469_v38 = vpack.c.bf16 %v3023_v35, %v1465_v16  ;;  %v1461_v44 = vpack.c.bf16 %v3023_v35, %v1455_v26  ;;  %v1498_v51 = vshrl.u32 %v1471_v39, 16  ;;  %v2531_v22 = vld [vmem:[#allocation8 + $0x20] sm:$0xff]   ;;  %v2534_v26 = vld [vmem:[#allocation8 + $0x38] sm:$0xff]   ;;  %v2536_v40 = vld [vmem:[#allocation8 + $0x90] sm:$0xff]  }
 0x319   :  { %v1101_v47 = vor.u32 %v1100_v33, %v1096_v30  ;;  %v1501_v10 = vshll.u32 %v1471_v39, 16  ;;  %v1473_v46 = vshrl.u32 %v1468_v42, 16  ;;  %v1476_v52 = vshll.u32 %v1468_v42, 16  ;;  %v1319_v30 = vld [vmem:[#allocation2 + $0x28] sm:$0x3]  ;;  %v1044_v39 = vld [vmem:[#allocation2] sm:$0xff] }
 0x31a   :  { %v1113_v45 = vor.u32 %v1112_v32, %v1108_v29  ;;  %v1490_v48 = vshrl.u32 %v1469_v38, 16  ;;  %v1493_v49 = vshll.u32 %v1469_v38, 16  ;;  %v1500_v57 = vrot.slane %v1498_v51, 1  ;;  %v1317_v29 = vld [vmem:[#allocation2 + $0x8] sm:$0xfc] }
 0x31b   :  { %v1106_v54 = vsel %vm137_vm0, %v1101_v47, %v1105_v23  ;;  %v1503_v58 = vrot.slane %v1501_v10, 2  ;;  %v1475_v59 = vrot.slane %v1473_v46, 1  ;;  %v1478_v60 = vrot.slane %v1476_v52, 2  ;;  %v2532_v23 = vld [vmem:[#allocation8 + $0x28] sm:$0xff]   ;;  %v1609_v38 = vld [vmem:[#allocation2 + $0x48] sm:$0xf] }
 0x31c   :  { %v1118_v53 = vsel %vm137_vm0, %v1113_v45, %v1117_v20  ;;  %v1492_v55 = vrot.slane %v1490_v48, 1  ;;  %v1495_v56 = vrot.slane %v1493_v49, 2  ;;  %v1484_v63 = vshll.u32 %v1470_v43, 16  ;;  %v2530_v20 = vld [vmem:[#allocation8 + $0x18] sm:$0xff]   ;;  %v1458_v33 = vld [vmem:[#allocation2 + $0x40] sm:$0x3] }
 0x31d   :  { %2059 = vmatprep.mubr.msk.bf16.mxu0 %vm217_vm1, %v1118_v53  ;;  %v1504_v1 = vor.u32 %v1503_v58, %v1500_v57  ;;  %v1479_v3 = vor.u32 %v1478_v60, %v1475_v59  ;;  %v1483_v4 = vrot.slane %v1481_v62, 1  ;;  %v1558_v9 = vrot.slane %v1461_v44, 1  ;;  %v1454_v42 = vld [vmem:[#allocation2 + $0x20] sm:$0xfc]  ;;  %v2541_v57 = vld [vmem:[#allocation8 + $0xb8] sm:$0xff]   ;;  %v2542_v58 = vld [vmem:[#allocation8 + $0xc0] sm:$0xff]  }
 0x31e   :  { %1210 = vmatmul.mubr.bf16.vlgmr.msra.gmra.mrb[8].mxu0 %v1106_v54  ;;  %v1496_v61 = vor.u32 %v1495_v56, %v1492_v55  ;;  %v1486_v19 = vrot.slane %v1484_v63, 2  ;;  %v1559_v12 = vrot.slane %v1463_v5, 1  ;;  %v1321_v36 = vpack.c.bf16 %v3016_v27, %v1317_v29  ;;  %v1607_v5 = vld [vmem:[#allocation2 + $0x28] sm:$0xf0]  ;;  %v2539_v55 = vld [vmem:[#allocation8 + $0xa8] sm:$0xff]  }
 0x31f   :  { %1276 = vmatpush1.bf16.msra.mxu0 %v2527_v50  ;;  %2069 = vmatprep.mubr.msk.bf16.mxu0 %vm217_vm1, %v1049_v34  ;;  %v2535_v34 = vld [vmem:[#allocation8 + $0x40] sm:$0xff]   ;;  %v1323_v32 = vpack.c.bf16 %v1319_v30, %v1319_v30  ;;  %v1048_v43 = vpack.c.bf16 %v3018_v7, %v1044_v39  ;;  %v1460_v44 = vpack.c.bf16 %v3025_v37, %v1454_v42  ;;  %v2540_v56 = vld [vmem:[#allocation8 + $0xb0] sm:$0xff]   ;;  %v2543_v59 = vld [vmem:[#allocation8 + $0xc8] sm:$0xff]   ;;  %vm1967_vm0 = vcmask 1044480  }
 0x320   :  { %1277 = vmatprep.subr.bf16.mxu0 %v2677_v0  ;;  %v1505_v8 = vsel %vm517_vm2, %v1496_v61, %v1504_v1  ;;  %v1487_v13 = vor.u32 %v1486_v19, %v1483_v4  ;;  %v1560_v18 = vsel %vm391_vm3, %v1558_v9, %v1559_v12  ;;  %v1350_v41 = vrot.slane %v1321_v36, 1  ;;  %v1316_v60 = vld [vmem:[#allocation2] sm:$0xfc]  ;;  %v1318_v61 = vld [vmem:[#allocation2 + $0x20] sm:$0x3]  ;;  %v2544_v63 = vld [vmem:[#allocation8 + $0xd0] sm:$0xff]  }
 0x321   :  { %2080 = vmatprep.mubr.msk.bf16.mxu1 %vm217_vm1, %v1505_v8  ;;  %v1462_v27 = vpack.c.bf16 %v1458_v33, %v1458_v33  ;;  %v1351_v45 = vrot.slane %v1323_v32, 1  ;;  %v1611_v47 = vpack.c.bf16 %v3023_v35, %v1607_v5  ;;  %v1613_v48 = vpack.c.bf16 %v1609_v38, %v1609_v38  ;;  %v2538_v35 = vld [vmem:[#allocation8 + $0xa0] sm:$0xff]   ;;  %v1606_v19 = vld [vmem:[#allocation2 + $0x20] sm:$0xf0] }
 0x322   :  { %v1488_v16 = vsel %vm517_vm2, %v1479_v3, %v1487_v13  ;;  %v1555_v51 = vrot.slane %v1460_v44, 1  ;;  %v1320_v62 = vpack.c.bf16 %v3018_v7, %v1316_v60  ;;  %v1322_v1 = vpack.c.bf16 %v1318_v61, %v1318_v61  ;;  %v1608_v3 = vld [vmem:[#allocation2 + $0x40] sm:$0xf]  ;;  %v1960_v39 = vld [vmem:[#allocation3 + $0x48] sm:$0x7] }
 0x323   :  { %1278 = vmatpush1.bf16.msra.mxu0 %v2528_v2  ;;  %1543 = vmatmul.mubr.bf16.vlgmr.msra.gmra.mrb[8].mxu1 %v1488_v16  ;;  %v1352_v49 = vsel %vm391_vm3, %v1350_v41, %v1351_v45  ;;  %v1556_v10 = vrot.slane %v1462_v27, 1  ;;  %v1621_v46 = vrot.slane %v1611_v47, 2  ;;  %v1622_v52 = vrot.slane %v1613_v48, 2  ;;  %v1918_v16 = vld [vmem:[#allocation3 + $0x28] sm:$0x1]  ;;  %v1957_v29 = vld [vmem:[#allocation3 + $0x30] sm:$0xff] }
 0x324   :  { %1279 = vmatprep.subr.bf16.mxu0 %v2677_v0  ;;  %1566 = vmatpush1.bf16.msra.mxu1 %v2527_v50  ;;  %v2537_v50 = vld [vmem:[#allocation8 + $0x98] sm:$0xff]   ;;  %v1348_v4 = vrot.slane %v1322_v1, 1  ;;  %v1610_v8 = vpack.c.bf16 %v3025_v37, %v1606_v19  ;;  %v1612_v9 = vpack.c.bf16 %v1608_v3, %v1608_v3  ;;  %v1969_v38 = vrot.slane %v1957_v29, 3 }
 0x325   :  { %2081 = vmatprep.mubr.msk.bf16.mxu1 %vm217_vm1, %v1560_v18  ;;  %1567 = vmatprep.subr.bf16.mxu1 %v2677_v0  ;;  %v1557_v53 = vsel %vm391_vm3, %v1555_v51, %v1556_v10  ;;  %v1623_v54 = vsel %vm664_vm4, %v1621_v46, %v1622_v52  ;;  %v1976_v42 = vrot.slane %v1960_v39, 3 }
 0x326   :  { %v1618_v12 = vrot.slane %v1610_v8, 2  ;;  %v1619_v13 = vrot.slane %v1612_v9, 2 }
 0x327   :  { %1280 = vmatpush1.bf16.msra.mxu0 %v2529_v15 }
 0x328   :  { %1281 = vmatprep.subr.bf16.mxu0 %v2677_v0  ;;  %1568 = vmatpush1.bf16.msra.mxu1 %v2528_v2  ;;  %v1347_v2 = vrot.slane %v1320_v62, 1  ;;  %v1620_v37 = vsel %vm664_vm4, %v1618_v12, %v1619_v13 }
 0x329   :  { %1569 = vmatprep.subr.bf16.mxu1 %v2677_v0 }
 0x32a   :  { %v1349_v7 = vsel %vm391_vm3, %v1347_v2, %v1348_v4 }
 0x32b   :  { %1282 = vmatpush1.bf16.msra.mxu0 %v2530_v20 }
 0x32c   :  { %1283 = vmatprep.subr.bf16.mxu0 %v2677_v0  ;;  %1570 = vmatpush1.bf16.msra.mxu1 %v2529_v15 }
 0x32d   :  { %1571 = vmatprep.subr.bf16.mxu1 %v2677_v0 }
 0x32f   :  { %1284 = vmatpush1.bf16.msra.mxu0 %v2531_v22 }
 0x330   :  { %1285 = vmatprep.subr.bf16.mxu0 %v2677_v0  ;;  %1572 = vmatpush1.bf16.msra.mxu1 %v2530_v20  ;;  %v1917_v20 = vld [vmem:[#allocation3 + $0x20] sm:$0x1] }
 0x331   :  { %1573 = vmatprep.subr.bf16.mxu1 %v2677_v0 }
 0x333   :  { %1286 = vmatpush1.bf16.msra.mxu0 %v2532_v23 }
 0x334   :  { %1287 = vmatprep.subr.bf16.mxu0 %v2677_v0  ;;  %1574 = vmatpush1.bf16.msra.mxu1 %v2531_v22  ;;  %v1956_v22 = vld [vmem:[#allocation3 + $0x28] sm:$0xf8] }
 0x335   :  { %1575 = vmatprep.subr.bf16.mxu1 %v2677_v0 }
 0x337   :  { %1288 = vmatpush1.bf16.msra.mxu0 %v2533_v25 }
 0x338   :  { %1289 = vmatprep.subr.bf16.mxu0 %v2677_v0  ;;  %1576 = vmatpush1.bf16.msra.mxu1 %v2532_v23 }
 0x339   :  { %1577 = vmatprep.subr.bf16.mxu1 %v2677_v0 }
 0x33b   :  { %1290 = vmatpush1.bf16.msra.mxu0 %v2534_v26 }
 0x33c   :  { %1291 = vmatprep.subr.bf16.mxu0 %v2677_v0  ;;  %1578 = vmatpush1.bf16.msra.mxu1 %v2533_v25  ;;  %v1932_v25 = vrot.slane %v1917_v20, 1 }
 0x33d   :  { %1579 = vmatprep.subr.bf16.mxu1 %v2677_v0 }
 0x33f   :  { %1292 = vmatpush1.bf16.msra.mxu0 %v2535_v34 }
 0x340   :  { %1411 = vmatprep.subr.bf16.mxu0 %v2677_v0  ;;  %1580 = vmatpush1.bf16.msra.mxu1 %v2534_v26  ;;  %v1955_v26 = vld [vmem:[#allocation3 + $0x20] sm:$0xf8] }
 0x341   :  { %1581 = vmatprep.subr.bf16.mxu1 %v2677_v0  ;;  %v1968_v33 = vrot.slane %v1955_v26, 3 }
 0x342   :  { %1308 = vmatmul.mubr.bf16.vlgmr.msra.gmra.mrb[8].mxu0 %v1048_v43 }
 0x343   :  { %1412 = vmatpush1.bf16.msra.mxu0 %v2536_v40  ;;  %2079 = vmatprep.mubr.msk.bf16.mxu0 %vm217_vm1, %v1352_v49  ;;  %v1970_v43 = vsel %vm1967_vm0, %v1968_v33, %v1969_v38 }
 0x344   :  { %1413 = vmatprep.subr.bf16.mxu0 %v2677_v0  ;;  %1582 = vmatpush1.bf16.msra.mxu1 %v2535_v34  ;;  %v1971_v34 = vrot.slane %v1956_v22, 3 }
 0x345   :  { %1628 = vmatprep.subr.bf16.mxu1 %v2677_v0 }
 0x347   :  { %1414 = vmatpush1.bf16.msra.mxu0 %v2537_v50  ;;  %1598 = vmatmul.mubr.bf16.vlgmr.msra.gmra.mrb[8].mxu1 %v1557_v53 }
 0x348   :  { %1415 = vmatprep.subr.bf16.mxu0 %v2677_v0  ;;  %1629 = vmatpush1.bf16.msra.mxu1 %v2536_v40  ;;  %v1959_v40 = vld [vmem:[#allocation3 + $0x40] sm:$0x7] }
 0x349   :  { %2082 = vmatprep.mubr.msk.bf16.mxu1 %vm217_vm1, %v1623_v54  ;;  %1630 = vmatprep.subr.bf16.mxu1 %v2677_v0  ;;  %v1974_v44 = vrot.slane %v1959_v40, 3  ;;  %vm1944_vm1 = vcmask 982016  }
 0x34b   :  { %1416 = vmatpush1.bf16.msra.mxu0 %v2538_v35  ;;  %v1975_v5 = vsel %vm1967_vm0, %v1969_v38, %v1974_v44 }
 0x34c   :  { %1417 = vmatprep.subr.bf16.mxu0 %v2677_v0  ;;  %1631 = vmatpush1.bf16.msra.mxu1 %v2537_v50 }
 0x34d   :  { %1632 = vmatprep.subr.bf16.mxu1 %v2677_v0 }
 0x34f   :  { %1418 = vmatpush1.bf16.msra.mxu0 %v2539_v55 }
 0x350   :  { %1419 = vmatprep.subr.bf16.mxu0 %v2677_v0  ;;  %1633 = vmatpush1.bf16.msra.mxu1 %v2538_v35 }
 0x351   :  { %1634 = vmatprep.subr.bf16.mxu1 %v2677_v0 }
 0x353   :  { %1420 = vmatpush1.bf16.msra.mxu0 %v2540_v56 }
 0x354   :  { %1421 = vmatprep.subr.bf16.mxu0 %v2677_v0  ;;  %1635 = vmatpush1.bf16.msra.mxu1 %v2539_v55 }
 0x355   :  { %1636 = vmatprep.subr.bf16.mxu1 %v2677_v0 }
 0x357   :  { %1422 = vmatpush1.bf16.msra.mxu0 %v2541_v57 }
 0x358   :  { %1423 = vmatprep.subr.bf16.mxu0 %v2677_v0  ;;  %1637 = vmatpush1.bf16.msra.mxu1 %v2540_v56 }
 0x359   :  { %1638 = vmatprep.subr.bf16.mxu1 %v2677_v0 }
 0x35b   :  { %1424 = vmatpush1.bf16.msra.mxu0 %v2542_v58 }
 0x35c   :  { %1425 = vmatprep.subr.bf16.mxu0 %v2677_v0  ;;  %1639 = vmatpush1.bf16.msra.mxu1 %v2541_v57 }
 0x35d   :  { %1640 = vmatprep.subr.bf16.mxu1 %v2677_v0 }
 0x35f   :  { %1426 = vmatpush1.bf16.msra.mxu0 %v2543_v59 }
 0x360   :  { %1427 = vmatprep.subr.bf16.mxu0 %v2677_v0  ;;  %1641 = vmatpush1.bf16.msra.mxu1 %v2542_v58 }
 0x361   :  { %1642 = vmatprep.subr.bf16.mxu1 %v2677_v0 }
 0x363   :  { %1428 = vmatpush1.bf16.msra.mxu0 %v2544_v63 }
 0x364   :  { %2382 = vmatprep.subr.bf16.mxu0 %v2878_v6  ;;  %1643 = vmatpush1.bf16.msra.mxu1 %v2543_v59 }
 0x365   :  { %1644 = vmatprep.subr.bf16.mxu1 %v2677_v0  ;;  %v1914_v0 = vld [vmem:[#allocation3 + $0x8] sm:$0xfe] }
 0x366   :  { %1444 = vmatmul.mubr.bf16.vlgmr.msra.gmra.mrb[8].mxu0 %v1349_v7 }
 0x367   :  { %2384 = vmatpush3.bf16.msra.mxu0 %v2878_v6 }
 0x368   :  { %2386 = vmatprep.subr.bf16.mxu0 %v2884_v11  ;;  %1645 = vmatpush1.bf16.msra.mxu1 %v2544_v63 }
 0x369   :  { %2414 = vmatprep.subr.bf16.mxu1 %v2878_v6 }
 0x36b   :  { %2388 = vmatpush3.bf16.msra.mxu0 %v2884_v11  ;;  %1661 = vmatmul.mubr.bf16.vlgmr.msra.gmra.mrb[8].mxu1 %v1620_v37 }
 0x36c   :  { %2390 = vmatprep.subr.bf16.mxu0 %v2890_v14  ;;  %2416 = vmatpush3.bf16.msra.mxu1 %v2878_v6  ;;  %v1916_v6 = vld [vmem:[#allocation3 + $0x18] sm:$0xff] }
 0x36d   :  { %2418 = vmatprep.subr.bf16.mxu1 %v2884_v11 }
 0x36f   :  { %2392 = vmatpush3.bf16.msra.mxu0 %v2890_v14 }
 0x370   :  { %2394 = vmatprep.subr.bf16.mxu0 %v2896_v17  ;;  %2420 = vmatpush3.bf16.msra.mxu1 %v2884_v11  ;;  %v1913_v11 = vld [vmem:[#allocation3] sm:$0xfe] }
 0x371   :  { %2422 = vmatprep.subr.bf16.mxu1 %v2890_v14  ;;  %v1926_v15 = vrot.slane %v1913_v11, 1 }
 0x373   :  { %2396 = vmatpush3.bf16.msra.mxu0 %v2896_v17 }
 0x374   :  { %2398 = vmatprep.subr.bf16.mxu0 %v2902_v21  ;;  %2424 = vmatpush3.bf16.msra.mxu1 %v2890_v14  ;;  %v1929_v14 = vrot.slane %v1914_v0, 1 }
 0x375   :  { %2426 = vmatprep.subr.bf16.mxu1 %v2896_v17 }
 0x377   :  { %2400 = vmatpush3.bf16.msra.mxu0 %v2902_v21 }
 0x378   :  { %2402 = vmatprep.subr.bf16.mxu0 %v2908_v24  ;;  %2428 = vmatpush3.bf16.msra.mxu1 %v2896_v17  ;;  %v1930_v17 = vrot.slane %v1916_v6, 1 }
 0x379   :  { %2430 = vmatprep.subr.bf16.mxu1 %v2902_v21 }
 0x37a   :  { %v1931_v23 = vsel %vm391_vm3, %v1929_v14, %v1930_v17 }
 0x37b   :  { %2404 = vmatpush3.bf16.msra.mxu0 %v2908_v24  ;;  %1938 = vrot.lane.b32.xlu1 %v1931_v23, %s2679_s3 }
 0x37c   :  { %2406 = vmatprep.subr.bf16.mxu0 %v2914_v28  ;;  %2432 = vmatpush3.bf16.msra.mxu1 %v2902_v21  ;;  %v1915_v21 = vld [vmem:[#allocation3 + $0x10] sm:$0xff] }
 0x37d   :  { %2434 = vmatprep.subr.bf16.mxu1 %v2908_v24  ;;  %v1927_v18 = vrot.slane %v1915_v21, 1 }
 0x37f   :  { %2408 = vmatpush3.bf16.msra.mxu0 %v2914_v28  ;;  %v1933_v32 = vsel %vm391_vm3, %v1927_v18, %v1932_v25 }
 0x380   :  { %2410 = vmatprep.subr.bf16.mxu0 %v2920_v31  ;;  %2436 = vmatpush3.bf16.msra.mxu1 %v2908_v24  ;;  %v1934_v24 = vrot.slane %v1918_v16, 1 }
 0x381   :  { %2438 = vmatprep.subr.bf16.mxu1 %v2914_v28 }
 0x382   :  { %v1935_v30 = vsel %vm391_vm3, %v1930_v17, %v1934_v24 }
 0x383   :  { %2412 = vmatpush3.bf16.msra.mxu0 %v2920_v31  ;;  %1942 = vrot.lane.b32.xlu1 %v1935_v30, %s2679_s3 }
 0x384   :  { %2440 = vmatpush3.bf16.msra.mxu1 %v2914_v28  ;;  %v1958_v28 = vld [vmem:[#allocation3 + $0x38] sm:$0xff] }
 0x385   :  { %2442 = vmatprep.subr.bf16.mxu1 %v2920_v31  ;;  %v1972_v36 = vrot.slane %v1958_v28, 3 }
 0x387   :  { %v1973_v41 = vsel %vm1967_vm0, %v1971_v34, %v1972_v36  ;;  %v1977_v27 = vsel %vm1967_vm0, %v1972_v36, %v1976_v42  ;;  %v2083_v36 = vld [vmem:[%s3154_s5] ss:$0 sm:$0xff]  ;;  %s2680_s5 = smov [#allocation11]  }
 0x388   :  { %2444 = vmatpush3.bf16.msra.mxu1 %v2920_v31  ;;  %v1928_v31 = vsel %vm391_vm3, %v1926_v15, %v1927_v18  ;;  %1980 = vrot.lane.b32.xlu1 %v1973_v41, %s2679_s3  ;;  %v2084_v42 = vld [vmem:[%s3155_s6] ss:$0 sm:$0xff]  ;;  %s2001_s19 = sshll.u32 %s2680_s5, 4  ;;  %s2002_s19 = int_to_ptr.vmem [resolvable:$true] %s2001_s19 }
 0x389   :  { %1936 = vrot.lane.b32.xlu0 %v1928_v31, %s2679_s3  ;;  %s2637_s6 = scalar_lea.vmem %s2002_s19, 512  ;;  %p2642_p5 = scmp.lt.s32.totalorder %s2002_s19, %s2002_s19 }
 0x38a   :  { %p2638_p4 = scmp.ne.s32.totalorder %s2002_s19, %s2637_s6  ;;  %p2643_p6 = scmp.lt.s32.totalorder %s2637_s6, %s2637_s6 }
 0x38c   :  { %1984 = vrot.lane.b32.xlu1 %v1977_v27, %s2679_s3  ;;  %p2644_p7 = por %p2643_p6, %p2642_p5 }
 0x38d   :  { %1940 = vrot.lane.b32.xlu0 %v1933_v32, %s2679_s3 }
 0x38e   :  { %p2645_p8 = pnand %p2644_p7, %p2638_p4 }
 0x391   :  { %1978 = vrot.lane.b32.xlu0 %v1970_v43, %s2679_s3 }
 0x395   :  { %1982 = vrot.lane.b32.xlu0 %v1975_v5, %s2679_s3 }
 0x3ed   :  { %v1939_v21 = vpop.permute.xlu1 %1938 }
 0x3f5   :  { %v1943_v26 = vpop.permute.xlu1 %1942 }
 0x3fa   :  { %v1981_v29 = vpop.permute.xlu1 %1980 }
 0x3fb   :  { %v1937_v15 = vpop.permute.xlu0 %1936 }
 0x3fe   :  { %v1985_v39 = vpop.permute.xlu1 %1984 }
 0x3ff   :  { %v1941_v31 = vpop.permute.xlu0 %1940 }
 0x403   :  { %v1979_v30 = vpop.permute.xlu0 %1978 }
 0x407   :  { %v1983_v41 = vpop.permute.xlu0 %1982 }
 0x439   :  { %v3122_v45 = vpop.f32.mrb[8].mxu0 }
 0x43a   :  { %v1783_v47 = vmul.f32 %v3122_v45, %v3122_v45  ;;  %v1447_v48 = vpop.f32.mrb[9].mxu0  ;;  %2273 = vmatprep.mubr.f32.mxu0 %v3122_v45 }
 0x43b   :  { %v1448_v49 = vpop.f32.mrb[10].mxu0 }
 0x43c   :  { %v1784_v50 = vmul.f32 %v1448_v49, %v1448_v49  ;;  %v1450_v51 = vpop.f32.mrb[11].mxu0  ;;  %2274 = vmatmul.mubr.f32.vlgmr.msra.gmra.mrb[12].mxu0 %v1448_v49  ;;  %2311 = vmatprep.mubr.f32.mxu1 %v1783_v47 }
 0x43d   :  { %v1945_v51 = vsel %vm1944_vm1, %v1937_v15, %v1939_v21 }
 0x43e   :  { %2312 = vmatmul.mubr.f32.vlgmr.msra.gmra.mrb[12].mxu1 %v1784_v50  ;;  %v1662_v10 = vpop.f32.mrb[8].mxu1 }
 0x43f   :  { %v1785_v46 = vmul.f32 %v1662_v10, %v1662_v10  ;;  %v1664_v52 = vpop.f32.mrb[9].mxu1  ;;  %2276 = vmatprep.mubr.f32.mxu0 %v1662_v10 }
 0x440   :  { %v1665_v35 = vpop.f32.mrb[10].mxu1 }
 0x441   :  { %v1786_v53 = vmul.f32 %v1665_v35, %v1665_v35  ;;  %v1667_v54 = vpop.f32.mrb[11].mxu1  ;;  %2277 = vmatmul.mubr.f32.gmra.mrb[14].mxu0 %v1665_v35  ;;  %2314 = vmatprep.mubr.f32.mxu1 %v1785_v46  ;;  %v1986_v46 = vsel %vm1944_vm1, %v1979_v30, %v1981_v29 }
 0x443   :  { %2315 = vmatmul.mubr.f32.gmra.mrb[14].mxu1 %v1786_v53 }
 0x50f   :  { %v2275_v55 = vpop.f32.mrb[12].mxu0 }
 0x510   :  { %v1755_v56 = vpop.f32.mrb[13].mxu0 }
 0x511   :  { %v1774_v57 = vadd.f32 %v2275_v55, %v1755_v56  ;;  %v2313_v58 = vpop.f32.mrb[12].mxu1 }
 0x512   :  { %v1853_v59 = vpop.f32.mrb[13].mxu1 }
 0x513   :  { %v1872_v60 = vadd.f32 %v2313_v58, %v1853_v59 }
 0x514   :  { %v2278_v61 = vpop.f32.mrb[14].mxu0 }
 0x515   :  { %v1765_v62 = vpop.f32.mrb[15].mxu0 }
 0x516   :  { %v1775_v63 = vadd.f32 %v1774_v57, %v1765_v62  ;;  %v2316_v1 = vpop.f32.mrb[14].mxu1 }
 0x517   :  { %v1863_v2 = vpop.f32.mrb[15].mxu1 }
 0x518   :  { %v1776_v3 = vadd.f32 %v2278_v61, %v1775_v63  ;;  %v1873_v4 = vadd.f32 %v1872_v60, %v1863_v2 }
 0x51a   :  { %v1777_v19 = vrot.slane %v1776_v3, 4  ;;  %v1874_v8 = vadd.f32 %v2316_v1, %v1873_v4 }
 0x51c   :  { %v1778_v9 = vadd.f32 %v1777_v19, %v1776_v3  ;;  %v1875_v7 = vrot.slane %v1874_v8, 4 }
 0x51e   :  { %v1779_v12 = vrot.slane %v1778_v9, 2  ;;  %v1876_v13 = vadd.f32 %v1875_v7, %v1874_v8 }
 0x520   :  { %v1780_v37 = vadd.f32 %v1779_v12, %v1778_v9  ;;  %v1877_v0 = vrot.slane %v1876_v13, 2 }
 0x522   :  { %v1781_v6 = vrot.slane %v1780_v37, 1  ;;  %v1878_v11 = vadd.f32 %v1877_v0, %v1876_v13 }
 0x524   :  { %v1782_v14 = vadd.f32 %v1781_v6, %v1780_v37  ;;  %v1879_v17 = vrot.slane %v1878_v11, 1 }
 0x526   :  { %v1880_v16 = vadd.f32 %v1879_v17, %v1878_v11  ;;  %v1881_v18 = vmul.f32 %v1782_v14, %v1782_v14  ;;  %v1883_v24 = vsub.f32 %v3122_v45, %v1782_v14  ;;  %v1884_v20 = vsub.f32 %v1448_v49, %v1782_v14 }
 0x527   :  { %v1885_v22 = vsub.f32 %v1662_v10, %v1782_v14  ;;  %v1886_v23 = vsub.f32 %v1665_v35, %v1782_v14  ;;  %v1987_v45 = vsel %vm1944_vm1, %v1983_v41, %v1985_v39  ;;  %v1946_v10 = vsel %vm1944_vm1, %v1941_v31, %v1943_v26 }
 0x528   :  { %v1882_v25 = vsub.f32 %v1880_v16, %v1881_v18 }
 0x52a   :  { %v1887_v28 = vadd.f32 1e-05, %v1882_v25 }
 0x52c   :  { %2547 = vrsqrt.f32 %v1887_v28 }
 0x536   :  { %v2548_v34 = vpop.eup %2547 }
 0x537   :  { %v1889_v32 = vmul.f32 %v2548_v34, %v1883_v24  ;;  %v1890_v33 = vmul.f32 %v2548_v34, %v1884_v20  ;;  %v1891_v38 = vmul.f32 %v2548_v34, %v1885_v22  ;;  %v1892_v40 = vmul.f32 %v2548_v34, %v1886_v23 }
 0x539   :  { %v1899_v43 = vmul.f32 %v2083_v36, %v1889_v32  ;;  %v1900_v44 = vmul.f32 %v2083_v36, %v1890_v33  ;;  %v1901_v27 = vmul.f32 %v2083_v36, %v1891_v38  ;;  %v1902_v5 = vmul.f32 %v2083_v36, %v1892_v40 }
 0x53b   :  { %v1909_v47 = vadd.f32 %v2084_v42, %v1899_v43  ;;  %v1910_v48 = vadd.f32 %v2084_v42, %v1900_v44  ;;  %v1911_v49 = vadd.f32 %v2084_v42, %v1901_v27  ;;  %v1912_v50 = vadd.f32 %v2084_v42, %v1902_v5 }
 0x53d   :  { %v1949_v52 = vadd.f32 %v1945_v51, %v1909_v47  ;;  %v1950_v35 = vadd.f32 %v1946_v10, %v1910_v48  ;;  %v1990_v53 = vadd.f32 %v1986_v46, %v1911_v49  ;;  %v1991_v54 = vadd.f32 %v1987_v45, %v1912_v50 }
 0x53f   :  { %v1951_v55 = vmax.f32 %v1949_v52, 0.0  ;;  %v1952_v56 = vmax.f32 %v1950_v35, 0.0  ;;  %v1992_v57 = vmax.f32 %v1990_v53, 0.0  ;;  %v1993_v58 = vmax.f32 %v1991_v54, 0.0 }
 0x541   :  { %1953 = vst [vmem:[#allocation11] sm:$0xff] %v1951_v55  ;;  %1954 = vst [vmem:[#allocation11 + $0x8] sm:$0xff] %v1952_v56 }
 0x542   :  { %1994 = vst [vmem:[#allocation11 + $0x10] sm:$0xff] %v1992_v57  ;;  %1995 = vst [vmem:[#allocation11 + $0x18] sm:$0xff] %v1993_v58 }
 0x543   :  { %2648 = shalt.err (!%p2645_p8)
}
 0x544   :  { %s2649_s23 = scalar_lea.hbm %s3157_s8, 512 }
 0x545   :  { %p2650_p9 = scmp.ne.s32.totalorder %s3157_s8, %s2649_s23  ;;  %p2653_p10 = scmp.lt.u32.totalorder %s2649_s23, %s3157_s8 }
 0x547   :  { %p2655_p11 = pnand %p2653_p10, %p2650_p9 }
 0x549   :  { %2658 = shalt.err (!%p2655_p11)
}
 0x54a   :  { %2007 = dma.vmem_to_hbm [thread:$0]  %s2002_s19, 512, %s3157_s8, [#allocation5], %s2675_s2, %s2675_s2, %s2676_s15  }
 0x54b   :  { %2665 = dma.done.wait [#allocation5], 512  }
 0x54c   :  { %2666 = vsyncadd [#allocation5], 4294966784 }
 0x54d   :  { %2011 = vsyncpa [#allocation4], 1 }
 0x54e   :  { %2012 = vsyncpa [#allocation7], 1 }
 0x54f   :  { %2013 = vsyncpa [#allocation10], 1 }
 0x550   :  { %2014 = vsyncpa [#allocation5], 1 }

</bundles_post_ra>
